<compile_context>
chip_gen: v7x
topology: tpu7x:2x2x1
jax: 0.10.0
libtpu: 0.0.40
codegen_flags: <defaults>
</compile_context>

<pallas_src>
import jax
import jax.numpy as jnp
from jax import lax
from jax.experimental import pallas as pl
from jax.experimental.pallas import tpu as pltpu

# ----------------------- small ViT config (synthetic) -----------------------
BATCH = 2
IN_CH = 3
IMAGE = 16
PATCH = 8
WIDTH = 32                    # transformer width (D)
HEADS = 4
HEAD_DIM = WIDTH // HEADS
LAYERS = 2
MLP_DIM = 4 * WIDTH
OUT_DIM = 16                  # projection / embedding dim
N_PATCH = (IMAGE // PATCH) ** 2
SEQ = N_PATCH + 1             # 5 (cls + patches)
S_PAD = 8                     # sequence padded to the 8-sublane tile
ROWS = BATCH * S_PAD          # flattened activation rows
LN_EPS = 1e-5


# --------------------------------- helpers ----------------------------------
def _layernorm(x, g, b, eps=LN_EPS):
    mu = jnp.mean(x, axis=-1, keepdims=True)
    var = jnp.mean(jnp.square(x - mu), axis=-1, keepdims=True)
    return (x - mu) * lax.rsqrt(var + eps) * g + b


def _split_heads(t2d, lane_off):
    """(ROWS, ...) lane block at lane_off -> (HEADS*BATCH, S_PAD, HEAD_DIM).

    Uses only 8-lane-aligned static slices, a leading-axis stack, and a
    tile-aligned sublane-splitting reshape (all cheap relayouts on TPU).
    """
    parts = [t2d[:, lane_off + h * HEAD_DIM: lane_off + (h + 1) * HEAD_DIM]
             for h in range(HEADS)]
    stacked = jnp.stack(parts, axis=0)                   # (H, ROWS, hd)
    return stacked.reshape(HEADS * BATCH, S_PAD, HEAD_DIM)


# ------------------------------ fused kernel --------------------------------
def clip_encode_kernel(
        patches_ref, wpatch_ref, posbias_ref, lnpre_g_ref, lnpre_b_ref,
        ln1g_ref, ln1b_ref, wqkv_ref, bqkv_ref, wo_ref, bo_ref,
        ln2g_ref, ln2b_ref, w1_ref, b1_ref, w2_ref, b2_ref,
        lnpost_g_ref, lnpost_b_ref, proj_ref, out_ref):
    # ---- patch embedding into the padded (ROWS, D) slab ----
    # (cls slot + pad rows of `patches` are zero, so their embedding is zero)
    emb = jnp.dot(patches_ref[...], wpatch_ref[...],
                  preferred_element_type=jnp.float32)            # (ROWS, D)
    # class token + positional embedding, pre-folded/padded/tiled at prep time
    x = emb + posbias_ref[...]
    x = _layernorm(x, lnpre_g_ref[...], lnpre_b_ref[...])        # ln_pre

    # additive mask for padded KEY columns (computed once, reused per layer)
    kidx = lax.broadcasted_iota(jnp.int32, (1, S_PAD), 1)
    key_bias = jnp.where(kidx < SEQ, 0.0, -1e30).astype(jnp.float32)

    dn_scores = (((2,), (2,)), ((0,), (0,)))   # (BH,S,hd) x (BH,S,hd) -> (BH,S,S)
    dn_pv = (((2,), (1,)), ((0,), (0,)))       # (BH,S,S)  x (BH,S,hd) -> (BH,S,hd)

    for l in range(LAYERS):                                      # static unroll
        # ------------- multi-head self-attention branch -------------
        h = _layernorm(x, ln1g_ref[l], ln1b_ref[l])
        # fused QKV: scale and biases pre-folded into wqkv/bqkv
        qkv = jnp.dot(h, wqkv_ref[l],
                      preferred_element_type=jnp.float32) + bqkv_ref[l]  # (ROWS, 3D)
        q = _split_heads(qkv, 0)                  # (B*H, S_PAD, hd), pre-scaled
        k = _split_heads(qkv, WIDTH)
        v = _split_heads(qkv, 2 * WIDTH)

        s = lax.dot_general(q, k, dn_scores,
                            preferred_element_type=jnp.float32)  # (B*H, S, S)
        s = s + key_bias                                          # mask pad keys
        s = s - jnp.max(s, axis=-1, keepdims=True)
        p = jnp.exp(s)
        p = p * pl.reciprocal(jnp.sum(p, axis=-1, keepdims=True), approx=True)
        ov = lax.dot_general(p, v, dn_pv,
                             preferred_element_type=jnp.float32)  # (B*H, S, hd)

        # merge heads back onto the lane axis: (B*H, S_PAD, hd) -> (ROWS, D)
        ov3 = ov.reshape(HEADS, ROWS, HEAD_DIM)
        merged = jnp.concatenate([ov3[hh] for hh in range(HEADS)], axis=-1)
        attn = jnp.dot(merged, wo_ref[l],
                       preferred_element_type=jnp.float32) + bo_ref[l]
        x = x + attn

        # ------------- MLP branch (QuickGELU) -------------
        hm = _layernorm(x, ln2g_ref[l], ln2b_ref[l])
        h1 = jnp.dot(hm, w1_ref[l],
                     preferred_element_type=jnp.float32) + b1_ref[l]
        h1 = h1 * jax.nn.sigmoid(1.702 * h1)                     # QuickGELU
        h2 = jnp.dot(h1, w2_ref[l],
                     preferred_element_type=jnp.float32) + b2_ref[l]
        x = x + h2

    # ---- head: cls token is row 0 of each padded 8-row block ----
    cls_tok = x.reshape(BATCH, S_PAD, WIDTH)[:, 0, :]            # (B, D)
    hh2 = _layernorm(cls_tok, lnpost_g_ref[...], lnpost_b_ref[...])
    y = jnp.dot(hh2, proj_ref[...], preferred_element_type=jnp.float32)
    # F.normalize(dim=-1) with eps=1e-12  (1e-24 == eps**2)
    sumsq = jnp.sum(y * y, axis=-1, keepdims=True)
    out_ref[...] = y * lax.rsqrt(jnp.maximum(sumsq, 1e-24))


# --------------------------------- wrapper -----------------------------------
def clip_encode_image(x, kp):
    """x: (B, IN_CH, IMAGE, IMAGE) NCHW float32 -> (B, OUT_DIM) unit-norm."""
    B = x.shape[0]
    hp = IMAGE // PATCH
    # conv1 (kernel=stride=PATCH, no bias) as im2col; pure layout glue in JAX.
    patches = x.reshape(B, IN_CH, hp, PATCH, hp, PATCH)
    patches = patches.transpose(0, 2, 4, 1, 3, 5)
    patches = patches.reshape(B, N_PATCH, IN_CH * PATCH * PATCH)
    # pad rows so each image owns an aligned 8-row block:
    # row 0 = class-token slot (zero), rows 1..N_PATCH = patches, rest = pad.
    patches = jnp.pad(patches, ((0, 0), (1, S_PAD - SEQ), (0, 0)))
    patches = patches.reshape(B * S_PAD, IN_CH * PATCH * PATCH)

    vmem = pl.BlockSpec(memory_space=pltpu.MemorySpace.VMEM)
    args = (patches, kp["w_patch"], kp["posbias"],
            kp["ln_pre_g"], kp["ln_pre_b"],
            kp["ln1g"], kp["ln1b"], kp["wqkv"], kp["bqkv"], kp["wo"], kp["bo"],
            kp["ln2g"], kp["ln2b"], kp["w1"], kp["b1"], kp["w2"], kp["b2"],
            kp["ln_post_g"], kp["ln_post_b"], kp["proj"])

    return pl.pallas_call(
        clip_encode_kernel,
        out_shape=jax.ShapeDtypeStruct((B, OUT_DIM), jnp.float32),
        in_specs=[vmem] * len(args),
        out_specs=vmem,
        compiler_params=pltpu.CompilerParams(
            vmem_limit_bytes=32 * 1024 * 1024),
    )(*args)


# ------------------------------ parameter init -------------------------------
def init_params(key):
    """PyTorch-layout parameters (as in clip.model.VisionTransformer)."""
    keys = iter(jax.random.split(key, 8 + 8 * LAYERS))

    def nrm(shape, scale=0.02):
        return (scale * jax.random.normal(next(keys), shape)).astype(jnp.float32)

    params = dict(
        conv_w=nrm((WIDTH, IN_CH, PATCH, PATCH)),
        class_emb=nrm((WIDTH,)),
        pos_emb=nrm((SEQ, WIDTH)),
        ln_pre_g=jnp.ones((WIDTH,), jnp.float32),
        ln_pre_b=jnp.zeros((WIDTH,), jnp.float32),
        ln_post_g=jnp.ones((WIDTH,), jnp.float32),
        ln_post_b=jnp.zeros((WIDTH,), jnp.float32),
        proj=nrm((WIDTH, OUT_DIM)),
        layers=[],
    )
    for _ in range(LAYERS):
        params["layers"].append(dict(
            ln1_g=jnp.ones((WIDTH,), jnp.float32),
            ln1_b=jnp.zeros((WIDTH,), jnp.float32),
            in_proj_w=nrm((3 * WIDTH, WIDTH)),    # nn.MultiheadAttention layout
            in_proj_b=nrm((3 * WIDTH,)),
            out_w=nrm((WIDTH, WIDTH)),
            out_b=nrm((WIDTH,)),
            ln2_g=jnp.ones((WIDTH,), jnp.float32),
            ln2_b=jnp.zeros((WIDTH,), jnp.float32),
            fc1_w=nrm((MLP_DIM, WIDTH)),
            fc1_b=nrm((MLP_DIM,)),
            fc2_w=nrm((WIDTH, MLP_DIM)),
            fc2_b=nrm((WIDTH,)),
        ))
    return params


def prepare_kernel_params(p):
    """PyTorch-layout params -> kernel-ready, layer-stacked, pre-folded arrays.

    * Wq/Wk/Wv (+biases) packed into one (D, 3D) weight / (1, 3D) bias with the
      1/sqrt(head_dim) scale folded into the Q part.
    * class token + positional embedding folded into one padded (ROWS, D) slab.
    """
    D = WIDTH
    scale = HEAD_DIM ** -0.5

    per = {k: [] for k in ("ln1g", "ln1b", "wqkv", "bqkv", "wo", "bo",
                           "ln2g", "ln2b", "w1", "b1", "w2", "b2")}
    for lyr in p["layers"]:
        wfull, bfull = lyr["in_proj_w"], lyr["in_proj_b"]
        wq, wk, wv = wfull[:D], wfull[D:2 * D], wfull[2 * D:]
        bq, bk, bv = bfull[:D], bfull[D:2 * D], bfull[2 * D:]
        per["wqkv"].append(jnp.concatenate([wq.T * scale, wk.T, wv.T], axis=1))
        per["bqkv"].append(jnp.concatenate([bq * scale, bk, bv]).reshape(1, 3 * D))
        per["wo"].append(lyr["out_w"].T)                    # (D, D)
        per["bo"].append(lyr["out_b"].reshape(1, D))
        per["ln1g"].append(lyr["ln1_g"].reshape(1, D))
        per["ln1b"].append(lyr["ln1_b"].reshape(1, D))
        per["ln2g"].append(lyr["ln2_g"].reshape(1, D))
        per["ln2b"].append(lyr["ln2_b"].reshape(1, D))
        per["w1"].append(lyr["fc1_w"].T)                    # (D, MLP)
        per["b1"].append(lyr["fc1_b"].reshape(1, MLP_DIM))
        per["w2"].append(lyr["fc2_w"].T)                    # (MLP, D)
        per["b2"].append(lyr["fc2_b"].reshape(1, D))
    kp = {k: jnp.stack(v) for k, v in per.items()}

    # positional embedding with the class embedding folded into row 0,
    # padded to S_PAD rows and tiled per batch element -> (ROWS, D).
    posbias = p["pos_emb"].at[0].add(p["class_emb"])        # (SEQ, D)
    posbias = jnp.pad(posbias, ((0, S_PAD - SEQ), (0, 0)))  # (S_PAD, D)

    kp.update(
        w_patch=p["conv_w"].reshape(WIDTH, IN_CH * PATCH * PATCH).T,
        posbias=jnp.tile(posbias, (BATCH, 1)),              # (ROWS, D)
        ln_pre_g=p["ln_pre_g"].reshape(1, WIDTH),
        ln_pre_b=p["ln_pre_b"].reshape(1, WIDTH),
        ln_post_g=p["ln_post_g"].reshape(1, WIDTH),
        ln_post_b=p["ln_post_b"].reshape(1, WIDTH),
        proj=p["proj"],
    )
    return kp


# ----------------------------------- main ------------------------------------
if __name__ == "__main__":
    key = jax.random.PRNGKey(0)
    pkey, xkey = jax.random.split(key)
    params = init_params(pkey)
    kparams = prepare_kernel_params(params)

    x = jax.random.normal(xkey, (BATCH, IN_CH, IMAGE, IMAGE), jnp.float32)

    out = jax.block_until_ready(clip_encode_image(x, kparams))

    assert out.shape == (BATCH, OUT_DIM), out.shape
    assert bool(jnp.all(jnp.isfinite(out)))
    norms = jnp.linalg.norm(out, axis=-1)
    assert bool(jnp.all(jnp.abs(norms - 1.0) < 1e-3)), norms

    print("KERNEL_OK")
</pallas_src>

<mosaic_0001>
module attributes {stable_mosaic.version = 11 : i64} {
  func.func @clip_encode_kernel(%arg0: memref<16x192xf32, #tpu.memory_space<vmem>>, %arg1: memref<192x32xf32, #tpu.memory_space<vmem>>, %arg2: memref<16x32xf32, #tpu.memory_space<vmem>>, %arg3: memref<1x32xf32, #tpu.memory_space<vmem>>, %arg4: memref<1x32xf32, #tpu.memory_space<vmem>>, %arg5: memref<2x1x32xf32, #tpu.memory_space<vmem>>, %arg6: memref<2x1x32xf32, #tpu.memory_space<vmem>>, %arg7: memref<2x32x96xf32, #tpu.memory_space<vmem>>, %arg8: memref<2x1x96xf32, #tpu.memory_space<vmem>>, %arg9: memref<2x32x32xf32, #tpu.memory_space<vmem>>, %arg10: memref<2x1x32xf32, #tpu.memory_space<vmem>>, %arg11: memref<2x1x32xf32, #tpu.memory_space<vmem>>, %arg12: memref<2x1x32xf32, #tpu.memory_space<vmem>>, %arg13: memref<2x32x128xf32, #tpu.memory_space<vmem>>, %arg14: memref<2x1x128xf32, #tpu.memory_space<vmem>>, %arg15: memref<2x128x32xf32, #tpu.memory_space<vmem>>, %arg16: memref<2x1x32xf32, #tpu.memory_space<vmem>>, %arg17: memref<1x32xf32, #tpu.memory_space<vmem>>, %arg18: memref<1x32xf32, #tpu.memory_space<vmem>>, %arg19: memref<32x16xf32, #tpu.memory_space<vmem>>, %arg20: memref<2x16xf32, #tpu.memory_space<vmem>>) attributes {dimension_semantics = [], scalar_prefetch = 0 : i64, scratch_operands = 0 : i64, tpu.core_type = #tpu.core_type<tc>} {
    %c0 = arith.constant 0 : index
    %c0_0 = arith.constant 0 : index
    %0 = vector.load %arg0[%c0, %c0_0] : memref<16x192xf32, #tpu.memory_space<vmem>>, vector<16x192xf32>
    %c0_1 = arith.constant 0 : index
    %c0_2 = arith.constant 0 : index
    %1 = vector.load %arg1[%c0_1, %c0_2] : memref<192x32xf32, #tpu.memory_space<vmem>>, vector<192x32xf32>
    %cst = arith.constant dense<0.000000e+00> : vector<16x32xf32>
    %2 = tpu.matmul %0, %1, %cst {dimension_numbers = #tpu.dot_dimension_numbers<[1], [0], [0], [1], [0, 0, 1, 1], [], []>} : vector<16x192xf32>, vector<192x32xf32>, vector<16x32xf32> -> vector<16x32xf32>
    %c0_3 = arith.constant 0 : index
    %c0_4 = arith.constant 0 : index
    %3 = vector.load %arg2[%c0_3, %c0_4] : memref<16x32xf32, #tpu.memory_space<vmem>>, vector<16x32xf32>
    %4 = arith.addf %2, %3 : vector<16x32xf32>
    %c0_5 = arith.constant 0 : index
    %c0_6 = arith.constant 0 : index
    %5 = vector.load %arg3[%c0_5, %c0_6] : memref<1x32xf32, #tpu.memory_space<vmem>>, vector<1x32xf32>
    %c0_7 = arith.constant 0 : index
    %c0_8 = arith.constant 0 : index
    %6 = vector.load %arg4[%c0_7, %c0_8] : memref<1x32xf32, #tpu.memory_space<vmem>>, vector<1x32xf32>
    %cst_9 = arith.constant dense<0.000000e+00> : vector<16xf32>
    %7 = vector.multi_reduction <add>, %4, %cst_9 [1] : vector<16x32xf32> to vector<16xf32>
    %8 = vector.shape_cast %7 : vector<16xf32> to vector<16x1xf32>
    %cst_10 = arith.constant 3.200000e+01 : f32
    %9 = vector.broadcast %cst_10 : f32 to vector<16x1xf32>
    %10 = arith.divf %8, %9 : vector<16x1xf32>
    %11 = vector.broadcast %10 : vector<16x1xf32> to vector<16x32xf32>
    %12 = arith.subf %4, %11 : vector<16x32xf32>
    %13 = arith.mulf %12, %12 : vector<16x32xf32>
    %cst_11 = arith.constant dense<0.000000e+00> : vector<16xf32>
    %14 = vector.multi_reduction <add>, %13, %cst_11 [1] : vector<16x32xf32> to vector<16xf32>
    %15 = vector.shape_cast %14 : vector<16xf32> to vector<16x1xf32>
    %cst_12 = arith.constant 3.200000e+01 : f32
    %16 = vector.broadcast %cst_12 : f32 to vector<16x1xf32>
    %17 = arith.divf %15, %16 : vector<16x1xf32>
    %18 = vector.broadcast %10 : vector<16x1xf32> to vector<16x32xf32>
    %19 = arith.subf %4, %18 : vector<16x32xf32>
    %cst_13 = arith.constant 9.99999974E-6 : f32
    %20 = vector.broadcast %cst_13 : f32 to vector<16x1xf32>
    %21 = arith.addf %17, %20 : vector<16x1xf32>
    %22 = math.rsqrt %21 : vector<16x1xf32>
    %23 = vector.broadcast %22 : vector<16x1xf32> to vector<16x32xf32>
    %24 = arith.mulf %19, %23 : vector<16x32xf32>
    %25 = vector.broadcast %5 : vector<1x32xf32> to vector<16x32xf32>
    %26 = arith.mulf %24, %25 : vector<16x32xf32>
    %27 = vector.broadcast %6 : vector<1x32xf32> to vector<16x32xf32>
    %28 = arith.addf %26, %27 : vector<16x32xf32>
    %29 = tpu.iota {dimensions = array<i32: 1>} : vector<1x8xi32>
    %c5_i32 = arith.constant 5 : i32
    %30 = vector.broadcast %c5_i32 : i32 to vector<1x8xi32>
    %31 = arith.cmpi slt, %29, %30 : vector<1x8xi32>
    %cst_14 = arith.constant 0.000000e+00 : f32
    %cst_15 = arith.constant -1.000000e+30 : f32
    %32 = vector.broadcast %cst_14 : f32 to vector<1x8xf32>
    %33 = vector.broadcast %cst_15 : f32 to vector<1x8xf32>
    %34 = arith.select %31, %32, %33 : vector<1x8xi1>, vector<1x8xf32>
    %c0_16 = arith.constant 0 : index
    %c0_17 = arith.constant 0 : index
    %c0_18 = arith.constant 0 : index
    %35 = vector.load %arg5[%c0_16, %c0_17, %c0_18] : memref<2x1x32xf32, #tpu.memory_space<vmem>>, vector<1x1x32xf32>
    %36 = vector.shape_cast %35 : vector<1x1x32xf32> to vector<1x32xf32>
    %c0_19 = arith.constant 0 : index
    %c0_20 = arith.constant 0 : index
    %c0_21 = arith.constant 0 : index
    %37 = vector.load %arg6[%c0_19, %c0_20, %c0_21] : memref<2x1x32xf32, #tpu.memory_space<vmem>>, vector<1x1x32xf32>
    %38 = vector.shape_cast %37 : vector<1x1x32xf32> to vector<1x32xf32>
    %cst_22 = arith.constant dense<0.000000e+00> : vector<16xf32>
    %39 = vector.multi_reduction <add>, %28, %cst_22 [1] : vector<16x32xf32> to vector<16xf32>
    %40 = vector.shape_cast %39 : vector<16xf32> to vector<16x1xf32>
    %cst_23 = arith.constant 3.200000e+01 : f32
    %41 = vector.broadcast %cst_23 : f32 to vector<16x1xf32>
    %42 = arith.divf %40, %41 : vector<16x1xf32>
    %43 = vector.broadcast %42 : vector<16x1xf32> to vector<16x32xf32>
    %44 = arith.subf %28, %43 : vector<16x32xf32>
    %45 = arith.mulf %44, %44 : vector<16x32xf32>
    %cst_24 = arith.constant dense<0.000000e+00> : vector<16xf32>
    %46 = vector.multi_reduction <add>, %45, %cst_24 [1] : vector<16x32xf32> to vector<16xf32>
    %47 = vector.shape_cast %46 : vector<16xf32> to vector<16x1xf32>
    %cst_25 = arith.constant 3.200000e+01 : f32
    %48 = vector.broadcast %cst_25 : f32 to vector<16x1xf32>
    %49 = arith.divf %47, %48 : vector<16x1xf32>
    %50 = vector.broadcast %42 : vector<16x1xf32> to vector<16x32xf32>
    %51 = arith.subf %28, %50 : vector<16x32xf32>
    %cst_26 = arith.constant 9.99999974E-6 : f32
    %52 = vector.broadcast %cst_26 : f32 to vector<16x1xf32>
    %53 = arith.addf %49, %52 : vector<16x1xf32>
    %54 = math.rsqrt %53 : vector<16x1xf32>
    %55 = vector.broadcast %54 : vector<16x1xf32> to vector<16x32xf32>
    %56 = arith.mulf %51, %55 : vector<16x32xf32>
    %57 = vector.broadcast %36 : vector<1x32xf32> to vector<16x32xf32>
    %58 = arith.mulf %56, %57 : vector<16x32xf32>
    %59 = vector.broadcast %38 : vector<1x32xf32> to vector<16x32xf32>
    %60 = arith.addf %58, %59 : vector<16x32xf32>
    %c0_27 = arith.constant 0 : index
    %c0_28 = arith.constant 0 : index
    %c0_29 = arith.constant 0 : index
    %61 = vector.load %arg7[%c0_27, %c0_28, %c0_29] : memref<2x32x96xf32, #tpu.memory_space<vmem>>, vector<1x32x96xf32>
    %62 = vector.shape_cast %61 : vector<1x32x96xf32> to vector<32x96xf32>
    %cst_30 = arith.constant dense<0.000000e+00> : vector<16x96xf32>
    %63 = tpu.matmul %60, %62, %cst_30 {dimension_numbers = #tpu.dot_dimension_numbers<[1], [0], [0], [1], [0, 0, 1, 1], [], []>} : vector<16x32xf32>, vector<32x96xf32>, vector<16x96xf32> -> vector<16x96xf32>
    %c0_31 = arith.constant 0 : index
    %c0_32 = arith.constant 0 : index
    %c0_33 = arith.constant 0 : index
    %64 = vector.load %arg8[%c0_31, %c0_32, %c0_33] : memref<2x1x96xf32, #tpu.memory_space<vmem>>, vector<1x1x96xf32>
    %65 = vector.shape_cast %64 : vector<1x1x96xf32> to vector<1x96xf32>
    %66 = vector.broadcast %65 : vector<1x96xf32> to vector<16x96xf32>
    %67 = arith.addf %63, %66 : vector<16x96xf32>
    %68 = vector.extract_strided_slice %67 {offsets = [0, 0], sizes = [16, 8], strides = [1, 1]} : vector<16x96xf32> to vector<16x8xf32>
    %69 = vector.extract_strided_slice %67 {offsets = [0, 8], sizes = [16, 8], strides = [1, 1]} : vector<16x96xf32> to vector<16x8xf32>
    %70 = vector.extract_strided_slice %67 {offsets = [0, 16], sizes = [16, 8], strides = [1, 1]} : vector<16x96xf32> to vector<16x8xf32>
    %71 = vector.extract_strided_slice %67 {offsets = [0, 24], sizes = [16, 8], strides = [1, 1]} : vector<16x96xf32> to vector<16x8xf32>
    %72 = vector.shape_cast %68 : vector<16x8xf32> to vector<1x16x8xf32>
    %73 = vector.shape_cast %69 : vector<16x8xf32> to vector<1x16x8xf32>
    %74 = vector.shape_cast %70 : vector<16x8xf32> to vector<1x16x8xf32>
    %75 = vector.shape_cast %71 : vector<16x8xf32> to vector<1x16x8xf32>
    %76 = tpu.concatenate %72, %73, %74, %75 in 0 : vector<1x16x8xf32>, vector<1x16x8xf32>, vector<1x16x8xf32>, vector<1x16x8xf32> -> vector<4x16x8xf32>
    %77 = vector.shape_cast %76 : vector<4x16x8xf32> to vector<8x8x8xf32>
    %78 = vector.extract_strided_slice %67 {offsets = [0, 32], sizes = [16, 8], strides = [1, 1]} : vector<16x96xf32> to vector<16x8xf32>
    %79 = vector.extract_strided_slice %67 {offsets = [0, 40], sizes = [16, 8], strides = [1, 1]} : vector<16x96xf32> to vector<16x8xf32>
    %80 = vector.extract_strided_slice %67 {offsets = [0, 48], sizes = [16, 8], strides = [1, 1]} : vector<16x96xf32> to vector<16x8xf32>
    %81 = vector.extract_strided_slice %67 {offsets = [0, 56], sizes = [16, 8], strides = [1, 1]} : vector<16x96xf32> to vector<16x8xf32>
    %82 = vector.shape_cast %78 : vector<16x8xf32> to vector<1x16x8xf32>
    %83 = vector.shape_cast %79 : vector<16x8xf32> to vector<1x16x8xf32>
    %84 = vector.shape_cast %80 : vector<16x8xf32> to vector<1x16x8xf32>
    %85 = vector.shape_cast %81 : vector<16x8xf32> to vector<1x16x8xf32>
    %86 = tpu.concatenate %82, %83, %84, %85 in 0 : vector<1x16x8xf32>, vector<1x16x8xf32>, vector<1x16x8xf32>, vector<1x16x8xf32> -> vector<4x16x8xf32>
    %87 = vector.shape_cast %86 : vector<4x16x8xf32> to vector<8x8x8xf32>
    %88 = vector.extract_strided_slice %67 {offsets = [0, 64], sizes = [16, 8], strides = [1, 1]} : vector<16x96xf32> to vector<16x8xf32>
    %89 = vector.extract_strided_slice %67 {offsets = [0, 72], sizes = [16, 8], strides = [1, 1]} : vector<16x96xf32> to vector<16x8xf32>
    %90 = vector.extract_strided_slice %67 {offsets = [0, 80], sizes = [16, 8], strides = [1, 1]} : vector<16x96xf32> to vector<16x8xf32>
    %91 = vector.extract_strided_slice %67 {offsets = [0, 88], sizes = [16, 8], strides = [1, 1]} : vector<16x96xf32> to vector<16x8xf32>
    %92 = vector.shape_cast %88 : vector<16x8xf32> to vector<1x16x8xf32>
    %93 = vector.shape_cast %89 : vector<16x8xf32> to vector<1x16x8xf32>
    %94 = vector.shape_cast %90 : vector<16x8xf32> to vector<1x16x8xf32>
    %95 = vector.shape_cast %91 : vector<16x8xf32> to vector<1x16x8xf32>
    %96 = tpu.concatenate %92, %93, %94, %95 in 0 : vector<1x16x8xf32>, vector<1x16x8xf32>, vector<1x16x8xf32>, vector<1x16x8xf32> -> vector<4x16x8xf32>
    %97 = vector.shape_cast %96 : vector<4x16x8xf32> to vector<8x8x8xf32>
    %cst_34 = arith.constant dense<0.000000e+00> : vector<8x8x8xf32>
    %98 = tpu.matmul %77, %87, %cst_34 {dimension_numbers = #tpu.dot_dimension_numbers<[2], [2], [1], [1], [0, 0, 0, 1, 1, 1], [0], [0]>} : vector<8x8x8xf32>, vector<8x8x8xf32>, vector<8x8x8xf32> -> vector<8x8x8xf32>
    %99 = vector.shape_cast %34 : vector<1x8xf32> to vector<1x1x8xf32>
    %100 = vector.broadcast %99 : vector<1x1x8xf32> to vector<8x8x8xf32>
    %101 = arith.addf %98, %100 : vector<8x8x8xf32>
    %cst_35 = arith.constant dense<0xFF800000> : vector<8x8xf32>
    %102 = vector.multi_reduction <maximumf>, %101, %cst_35 [2] : vector<8x8x8xf32> to vector<8x8xf32>
    %103 = vector.shape_cast %102 : vector<8x8xf32> to vector<8x8x1xf32>
    %104 = vector.broadcast %103 : vector<8x8x1xf32> to vector<8x8x8xf32>
    %105 = arith.subf %101, %104 : vector<8x8x8xf32>
    %106 = math.exp %105 : vector<8x8x8xf32>
    %cst_36 = arith.constant dense<0.000000e+00> : vector<8x8xf32>
    %107 = vector.multi_reduction <add>, %106, %cst_36 [2] : vector<8x8x8xf32> to vector<8x8xf32>
    %108 = vector.shape_cast %107 : vector<8x8xf32> to vector<8x8x1xf32>
    %109 = tpu.reciprocal %108 {approx = true} : vector<8x8x1xf32> -> vector<8x8x1xf32>
    %110 = vector.broadcast %109 : vector<8x8x1xf32> to vector<8x8x8xf32>
    %111 = arith.mulf %106, %110 : vector<8x8x8xf32>
    %cst_37 = arith.constant dense<0.000000e+00> : vector<8x8x8xf32>
    %112 = tpu.matmul %111, %97, %cst_37 {dimension_numbers = #tpu.dot_dimension_numbers<[2], [1], [1], [2], [0, 0, 0, 1, 1, 2], [0], [0]>} : vector<8x8x8xf32>, vector<8x8x8xf32>, vector<8x8x8xf32> -> vector<8x8x8xf32>
    %113 = vector.shape_cast %112 : vector<8x8x8xf32> to vector<4x16x8xf32>
    %114 = vector.extract_strided_slice %113 {offsets = [0, 0, 0], sizes = [1, 16, 8], strides = [1, 1, 1]} : vector<4x16x8xf32> to vector<1x16x8xf32>
    %115 = vector.shape_cast %114 : vector<1x16x8xf32> to vector<16x8xf32>
    %116 = vector.extract_strided_slice %113 {offsets = [1, 0, 0], sizes = [1, 16, 8], strides = [1, 1, 1]} : vector<4x16x8xf32> to vector<1x16x8xf32>
    %117 = vector.shape_cast %116 : vector<1x16x8xf32> to vector<16x8xf32>
    %118 = vector.extract_strided_slice %113 {offsets = [2, 0, 0], sizes = [1, 16, 8], strides = [1, 1, 1]} : vector<4x16x8xf32> to vector<1x16x8xf32>
    %119 = vector.shape_cast %118 : vector<1x16x8xf32> to vector<16x8xf32>
    %120 = vector.extract_strided_slice %113 {offsets = [3, 0, 0], sizes = [1, 16, 8], strides = [1, 1, 1]} : vector<4x16x8xf32> to vector<1x16x8xf32>
    %121 = vector.shape_cast %120 : vector<1x16x8xf32> to vector<16x8xf32>
    %122 = tpu.concatenate %115, %117, %119, %121 in 1 : vector<16x8xf32>, vector<16x8xf32>, vector<16x8xf32>, vector<16x8xf32> -> vector<16x32xf32>
    %c0_38 = arith.constant 0 : index
    %c0_39 = arith.constant 0 : index
    %c0_40 = arith.constant 0 : index
    %123 = vector.load %arg9[%c0_38, %c0_39, %c0_40] : memref<2x32x32xf32, #tpu.memory_space<vmem>>, vector<1x32x32xf32>
    %124 = vector.shape_cast %123 : vector<1x32x32xf32> to vector<32x32xf32>
    %cst_41 = arith.constant dense<0.000000e+00> : vector<16x32xf32>
    %125 = tpu.matmul %122, %124, %cst_41 {dimension_numbers = #tpu.dot_dimension_numbers<[1], [0], [0], [1], [0, 0, 1, 1], [], []>} : vector<16x32xf32>, vector<32x32xf32>, vector<16x32xf32> -> vector<16x32xf32>
    %c0_42 = arith.constant 0 : index
    %c0_43 = arith.constant 0 : index
    %c0_44 = arith.constant 0 : index
    %126 = vector.load %arg10[%c0_42, %c0_43, %c0_44] : memref<2x1x32xf32, #tpu.memory_space<vmem>>, vector<1x1x32xf32>
    %127 = vector.shape_cast %126 : vector<1x1x32xf32> to vector<1x32xf32>
    %128 = vector.broadcast %127 : vector<1x32xf32> to vector<16x32xf32>
    %129 = arith.addf %125, %128 : vector<16x32xf32>
    %130 = arith.addf %28, %129 : vector<16x32xf32>
    %c0_45 = arith.constant 0 : index
    %c0_46 = arith.constant 0 : index
    %c0_47 = arith.constant 0 : index
    %131 = vector.load %arg11[%c0_45, %c0_46, %c0_47] : memref<2x1x32xf32, #tpu.memory_space<vmem>>, vector<1x1x32xf32>
    %132 = vector.shape_cast %131 : vector<1x1x32xf32> to vector<1x32xf32>
    %c0_48 = arith.constant 0 : index
    %c0_49 = arith.constant 0 : index
    %c0_50 = arith.constant 0 : index
    %133 = vector.load %arg12[%c0_48, %c0_49, %c0_50] : memref<2x1x32xf32, #tpu.memory_space<vmem>>, vector<1x1x32xf32>
    %134 = vector.shape_cast %133 : vector<1x1x32xf32> to vector<1x32xf32>
    %cst_51 = arith.constant dense<0.000000e+00> : vector<16xf32>
    %135 = vector.multi_reduction <add>, %130, %cst_51 [1] : vector<16x32xf32> to vector<16xf32>
    %136 = vector.shape_cast %135 : vector<16xf32> to vector<16x1xf32>
    %cst_52 = arith.constant 3.200000e+01 : f32
    %137 = vector.broadcast %cst_52 : f32 to vector<16x1xf32>
    %138 = arith.divf %136, %137 : vector<16x1xf32>
    %139 = vector.broadcast %138 : vector<16x1xf32> to vector<16x32xf32>
    %140 = arith.subf %130, %139 : vector<16x32xf32>
    %141 = arith.mulf %140, %140 : vector<16x32xf32>
    %cst_53 = arith.constant dense<0.000000e+00> : vector<16xf32>
    %142 = vector.multi_reduction <add>, %141, %cst_53 [1] : vector<16x32xf32> to vector<16xf32>
    %143 = vector.shape_cast %142 : vector<16xf32> to vector<16x1xf32>
    %cst_54 = arith.constant 3.200000e+01 : f32
    %144 = vector.broadcast %cst_54 : f32 to vector<16x1xf32>
    %145 = arith.divf %143, %144 : vector<16x1xf32>
    %146 = vector.broadcast %138 : vector<16x1xf32> to vector<16x32xf32>
    %147 = arith.subf %130, %146 : vector<16x32xf32>
    %cst_55 = arith.constant 9.99999974E-6 : f32
    %148 = vector.broadcast %cst_55 : f32 to vector<16x1xf32>
    %149 = arith.addf %145, %148 : vector<16x1xf32>
    %150 = math.rsqrt %149 : vector<16x1xf32>
    %151 = vector.broadcast %150 : vector<16x1xf32> to vector<16x32xf32>
    %152 = arith.mulf %147, %151 : vector<16x32xf32>
    %153 = vector.broadcast %132 : vector<1x32xf32> to vector<16x32xf32>
    %154 = arith.mulf %152, %153 : vector<16x32xf32>
    %155 = vector.broadcast %134 : vector<1x32xf32> to vector<16x32xf32>
    %156 = arith.addf %154, %155 : vector<16x32xf32>
    %c0_56 = arith.constant 0 : index
    %c0_57 = arith.constant 0 : index
    %c0_58 = arith.constant 0 : index
    %157 = vector.load %arg13[%c0_56, %c0_57, %c0_58] : memref<2x32x128xf32, #tpu.memory_space<vmem>>, vector<1x32x128xf32>
    %158 = vector.shape_cast %157 : vector<1x32x128xf32> to vector<32x128xf32>
    %cst_59 = arith.constant dense<0.000000e+00> : vector<16x128xf32>
    %159 = tpu.matmul %156, %158, %cst_59 {dimension_numbers = #tpu.dot_dimension_numbers<[1], [0], [0], [1], [0, 0, 1, 1], [], []>} : vector<16x32xf32>, vector<32x128xf32>, vector<16x128xf32> -> vector<16x128xf32>
    %c0_60 = arith.constant 0 : index
    %c0_61 = arith.constant 0 : index
    %c0_62 = arith.constant 0 : index
    %160 = vector.load %arg14[%c0_60, %c0_61, %c0_62] : memref<2x1x128xf32, #tpu.memory_space<vmem>>, vector<1x1x128xf32>
    %161 = vector.shape_cast %160 : vector<1x1x128xf32> to vector<1x128xf32>
    %162 = vector.broadcast %161 : vector<1x128xf32> to vector<16x128xf32>
    %163 = arith.addf %159, %162 : vector<16x128xf32>
    %cst_63 = arith.constant 1.702000e+00 : f32
    %164 = vector.broadcast %cst_63 : f32 to vector<16x128xf32>
    %165 = arith.mulf %164, %163 : vector<16x128xf32>
    %166 = arith.negf %165 : vector<16x128xf32>
    %167 = math.exp %166 : vector<16x128xf32>
    %cst_64 = arith.constant 1.000000e+00 : f32
    %168 = vector.broadcast %cst_64 : f32 to vector<16x128xf32>
    %169 = arith.addf %168, %167 : vector<16x128xf32>
    %170 = arith.divf %168, %169 : vector<16x128xf32>
    %171 = arith.mulf %163, %170 : vector<16x128xf32>
    %c0_65 = arith.constant 0 : index
    %c0_66 = arith.constant 0 : index
    %c0_67 = arith.constant 0 : index
    %172 = vector.load %arg15[%c0_65, %c0_66, %c0_67] : memref<2x128x32xf32, #tpu.memory_space<vmem>>, vector<1x128x32xf32>
    %173 = vector.shape_cast %172 : vector<1x128x32xf32> to vector<128x32xf32>
    %cst_68 = arith.constant dense<0.000000e+00> : vector<16x32xf32>
    %174 = tpu.matmul %171, %173, %cst_68 {dimension_numbers = #tpu.dot_dimension_numbers<[1], [0], [0], [1], [0, 0, 1, 1], [], []>} : vector<16x128xf32>, vector<128x32xf32>, vector<16x32xf32> -> vector<16x32xf32>
    %c0_69 = arith.constant 0 : index
    %c0_70 = arith.constant 0 : index
    %c0_71 = arith.constant 0 : index
    %175 = vector.load %arg16[%c0_69, %c0_70, %c0_71] : memref<2x1x32xf32, #tpu.memory_space<vmem>>, vector<1x1x32xf32>
    %176 = vector.shape_cast %175 : vector<1x1x32xf32> to vector<1x32xf32>
    %177 = vector.broadcast %176 : vector<1x32xf32> to vector<16x32xf32>
    %178 = arith.addf %174, %177 : vector<16x32xf32>
    %179 = arith.addf %130, %178 : vector<16x32xf32>
    %c1 = arith.constant 1 : index
    %c0_72 = arith.constant 0 : index
    %c0_73 = arith.constant 0 : index
    %180 = vector.load %arg5[%c1, %c0_72, %c0_73] : memref<2x1x32xf32, #tpu.memory_space<vmem>>, vector<1x1x32xf32>
    %181 = vector.shape_cast %180 : vector<1x1x32xf32> to vector<1x32xf32>
    %c1_74 = arith.constant 1 : index
    %c0_75 = arith.constant 0 : index
    %c0_76 = arith.constant 0 : index
    %182 = vector.load %arg6[%c1_74, %c0_75, %c0_76] : memref<2x1x32xf32, #tpu.memory_space<vmem>>, vector<1x1x32xf32>
    %183 = vector.shape_cast %182 : vector<1x1x32xf32> to vector<1x32xf32>
    %cst_77 = arith.constant dense<0.000000e+00> : vector<16xf32>
    %184 = vector.multi_reduction <add>, %179, %cst_77 [1] : vector<16x32xf32> to vector<16xf32>
    %185 = vector.shape_cast %184 : vector<16xf32> to vector<16x1xf32>
    %cst_78 = arith.constant 3.200000e+01 : f32
    %186 = vector.broadcast %cst_78 : f32 to vector<16x1xf32>
    %187 = arith.divf %185, %186 : vector<16x1xf32>
    %188 = vector.broadcast %187 : vector<16x1xf32> to vector<16x32xf32>
    %189 = arith.subf %179, %188 : vector<16x32xf32>
    %190 = arith.mulf %189, %189 : vector<16x32xf32>
    %cst_79 = arith.constant dense<0.000000e+00> : vector<16xf32>
    %191 = vector.multi_reduction <add>, %190, %cst_79 [1] : vector<16x32xf32> to vector<16xf32>
    %192 = vector.shape_cast %191 : vector<16xf32> to vector<16x1xf32>
    %cst_80 = arith.constant 3.200000e+01 : f32
    %193 = vector.broadcast %cst_80 : f32 to vector<16x1xf32>
    %194 = arith.divf %192, %193 : vector<16x1xf32>
    %195 = vector.broadcast %187 : vector<16x1xf32> to vector<16x32xf32>
    %196 = arith.subf %179, %195 : vector<16x32xf32>
    %cst_81 = arith.constant 9.99999974E-6 : f32
    %197 = vector.broadcast %cst_81 : f32 to vector<16x1xf32>
    %198 = arith.addf %194, %197 : vector<16x1xf32>
    %199 = math.rsqrt %198 : vector<16x1xf32>
    %200 = vector.broadcast %199 : vector<16x1xf32> to vector<16x32xf32>
    %201 = arith.mulf %196, %200 : vector<16x32xf32>
    %202 = vector.broadcast %181 : vector<1x32xf32> to vector<16x32xf32>
    %203 = arith.mulf %201, %202 : vector<16x32xf32>
    %204 = vector.broadcast %183 : vector<1x32xf32> to vector<16x32xf32>
    %205 = arith.addf %203, %204 : vector<16x32xf32>
    %c1_82 = arith.constant 1 : index
    %c0_83 = arith.constant 0 : index
    %c0_84 = arith.constant 0 : index
    %206 = vector.load %arg7[%c1_82, %c0_83, %c0_84] : memref<2x32x96xf32, #tpu.memory_space<vmem>>, vector<1x32x96xf32>
    %207 = vector.shape_cast %206 : vector<1x32x96xf32> to vector<32x96xf32>
    %cst_85 = arith.constant dense<0.000000e+00> : vector<16x96xf32>
    %208 = tpu.matmul %205, %207, %cst_85 {dimension_numbers = #tpu.dot_dimension_numbers<[1], [0], [0], [1], [0, 0, 1, 1], [], []>} : vector<16x32xf32>, vector<32x96xf32>, vector<16x96xf32> -> vector<16x96xf32>
    %c1_86 = arith.constant 1 : index
    %c0_87 = arith.constant 0 : index
    %c0_88 = arith.constant 0 : index
    %209 = vector.load %arg8[%c1_86, %c0_87, %c0_88] : memref<2x1x96xf32, #tpu.memory_space<vmem>>, vector<1x1x96xf32>
    %210 = vector.shape_cast %209 : vector<1x1x96xf32> to vector<1x96xf32>
    %211 = vector.broadcast %210 : vector<1x96xf32> to vector<16x96xf32>
    %212 = arith.addf %208, %211 : vector<16x96xf32>
    %213 = vector.extract_strided_slice %212 {offsets = [0, 0], sizes = [16, 8], strides = [1, 1]} : vector<16x96xf32> to vector<16x8xf32>
    %214 = vector.extract_strided_slice %212 {offsets = [0, 8], sizes = [16, 8], strides = [1, 1]} : vector<16x96xf32> to vector<16x8xf32>
    %215 = vector.extract_strided_slice %212 {offsets = [0, 16], sizes = [16, 8], strides = [1, 1]} : vector<16x96xf32> to vector<16x8xf32>
    %216 = vector.extract_strided_slice %212 {offsets = [0, 24], sizes = [16, 8], strides = [1, 1]} : vector<16x96xf32> to vector<16x8xf32>
    %217 = vector.shape_cast %213 : vector<16x8xf32> to vector<1x16x8xf32>
    %218 = vector.shape_cast %214 : vector<16x8xf32> to vector<1x16x8xf32>
    %219 = vector.shape_cast %215 : vector<16x8xf32> to vector<1x16x8xf32>
    %220 = vector.shape_cast %216 : vector<16x8xf32> to vector<1x16x8xf32>
    %221 = tpu.concatenate %217, %218, %219, %220 in 0 : vector<1x16x8xf32>, vector<1x16x8xf32>, vector<1x16x8xf32>, vector<1x16x8xf32> -> vector<4x16x8xf32>
    %222 = vector.shape_cast %221 : vector<4x16x8xf32> to vector<8x8x8xf32>
    %223 = vector.extract_strided_slice %212 {offsets = [0, 32], sizes = [16, 8], strides = [1, 1]} : vector<16x96xf32> to vector<16x8xf32>
    %224 = vector.extract_strided_slice %212 {offsets = [0, 40], sizes = [16, 8], strides = [1, 1]} : vector<16x96xf32> to vector<16x8xf32>
    %225 = vector.extract_strided_slice %212 {offsets = [0, 48], sizes = [16, 8], strides = [1, 1]} : vector<16x96xf32> to vector<16x8xf32>
    %226 = vector.extract_strided_slice %212 {offsets = [0, 56], sizes = [16, 8], strides = [1, 1]} : vector<16x96xf32> to vector<16x8xf32>
    %227 = vector.shape_cast %223 : vector<16x8xf32> to vector<1x16x8xf32>
    %228 = vector.shape_cast %224 : vector<16x8xf32> to vector<1x16x8xf32>
    %229 = vector.shape_cast %225 : vector<16x8xf32> to vector<1x16x8xf32>
    %230 = vector.shape_cast %226 : vector<16x8xf32> to vector<1x16x8xf32>
    %231 = tpu.concatenate %227, %228, %229, %230 in 0 : vector<1x16x8xf32>, vector<1x16x8xf32>, vector<1x16x8xf32>, vector<1x16x8xf32> -> vector<4x16x8xf32>
    %232 = vector.shape_cast %231 : vector<4x16x8xf32> to vector<8x8x8xf32>
    %233 = vector.extract_strided_slice %212 {offsets = [0, 64], sizes = [16, 8], strides = [1, 1]} : vector<16x96xf32> to vector<16x8xf32>
    %234 = vector.extract_strided_slice %212 {offsets = [0, 72], sizes = [16, 8], strides = [1, 1]} : vector<16x96xf32> to vector<16x8xf32>
    %235 = vector.extract_strided_slice %212 {offsets = [0, 80], sizes = [16, 8], strides = [1, 1]} : vector<16x96xf32> to vector<16x8xf32>
    %236 = vector.extract_strided_slice %212 {offsets = [0, 88], sizes = [16, 8], strides = [1, 1]} : vector<16x96xf32> to vector<16x8xf32>
    %237 = vector.shape_cast %233 : vector<16x8xf32> to vector<1x16x8xf32>
    %238 = vector.shape_cast %234 : vector<16x8xf32> to vector<1x16x8xf32>
    %239 = vector.shape_cast %235 : vector<16x8xf32> to vector<1x16x8xf32>
    %240 = vector.shape_cast %236 : vector<16x8xf32> to vector<1x16x8xf32>
    %241 = tpu.concatenate %237, %238, %239, %240 in 0 : vector<1x16x8xf32>, vector<1x16x8xf32>, vector<1x16x8xf32>, vector<1x16x8xf32> -> vector<4x16x8xf32>
    %242 = vector.shape_cast %241 : vector<4x16x8xf32> to vector<8x8x8xf32>
    %cst_89 = arith.constant dense<0.000000e+00> : vector<8x8x8xf32>
    %243 = tpu.matmul %222, %232, %cst_89 {dimension_numbers = #tpu.dot_dimension_numbers<[2], [2], [1], [1], [0, 0, 0, 1, 1, 1], [0], [0]>} : vector<8x8x8xf32>, vector<8x8x8xf32>, vector<8x8x8xf32> -> vector<8x8x8xf32>
    %244 = vector.shape_cast %34 : vector<1x8xf32> to vector<1x1x8xf32>
    %245 = vector.broadcast %244 : vector<1x1x8xf32> to vector<8x8x8xf32>
    %246 = arith.addf %243, %245 : vector<8x8x8xf32>
    %cst_90 = arith.constant dense<0xFF800000> : vector<8x8xf32>
    %247 = vector.multi_reduction <maximumf>, %246, %cst_90 [2] : vector<8x8x8xf32> to vector<8x8xf32>
    %248 = vector.shape_cast %247 : vector<8x8xf32> to vector<8x8x1xf32>
    %249 = vector.broadcast %248 : vector<8x8x1xf32> to vector<8x8x8xf32>
    %250 = arith.subf %246, %249 : vector<8x8x8xf32>
    %251 = math.exp %250 : vector<8x8x8xf32>
    %cst_91 = arith.constant dense<0.000000e+00> : vector<8x8xf32>
    %252 = vector.multi_reduction <add>, %251, %cst_91 [2] : vector<8x8x8xf32> to vector<8x8xf32>
    %253 = vector.shape_cast %252 : vector<8x8xf32> to vector<8x8x1xf32>
    %254 = tpu.reciprocal %253 {approx = true} : vector<8x8x1xf32> -> vector<8x8x1xf32>
    %255 = vector.broadcast %254 : vector<8x8x1xf32> to vector<8x8x8xf32>
    %256 = arith.mulf %251, %255 : vector<8x8x8xf32>
    %cst_92 = arith.constant dense<0.000000e+00> : vector<8x8x8xf32>
    %257 = tpu.matmul %256, %242, %cst_92 {dimension_numbers = #tpu.dot_dimension_numbers<[2], [1], [1], [2], [0, 0, 0, 1, 1, 2], [0], [0]>} : vector<8x8x8xf32>, vector<8x8x8xf32>, vector<8x8x8xf32> -> vector<8x8x8xf32>
    %258 = vector.shape_cast %257 : vector<8x8x8xf32> to vector<4x16x8xf32>
    %259 = vector.extract_strided_slice %258 {offsets = [0, 0, 0], sizes = [1, 16, 8], strides = [1, 1, 1]} : vector<4x16x8xf32> to vector<1x16x8xf32>
    %260 = vector.shape_cast %259 : vector<1x16x8xf32> to vector<16x8xf32>
    %261 = vector.extract_strided_slice %258 {offsets = [1, 0, 0], sizes = [1, 16, 8], strides = [1, 1, 1]} : vector<4x16x8xf32> to vector<1x16x8xf32>
    %262 = vector.shape_cast %261 : vector<1x16x8xf32> to vector<16x8xf32>
    %263 = vector.extract_strided_slice %258 {offsets = [2, 0, 0], sizes = [1, 16, 8], strides = [1, 1, 1]} : vector<4x16x8xf32> to vector<1x16x8xf32>
    %264 = vector.shape_cast %263 : vector<1x16x8xf32> to vector<16x8xf32>
    %265 = vector.extract_strided_slice %258 {offsets = [3, 0, 0], sizes = [1, 16, 8], strides = [1, 1, 1]} : vector<4x16x8xf32> to vector<1x16x8xf32>
    %266 = vector.shape_cast %265 : vector<1x16x8xf32> to vector<16x8xf32>
    %267 = tpu.concatenate %260, %262, %264, %266 in 1 : vector<16x8xf32>, vector<16x8xf32>, vector<16x8xf32>, vector<16x8xf32> -> vector<16x32xf32>
    %c1_93 = arith.constant 1 : index
    %c0_94 = arith.constant 0 : index
    %c0_95 = arith.constant 0 : index
    %268 = vector.load %arg9[%c1_93, %c0_94, %c0_95] : memref<2x32x32xf32, #tpu.memory_space<vmem>>, vector<1x32x32xf32>
    %269 = vector.shape_cast %268 : vector<1x32x32xf32> to vector<32x32xf32>
    %cst_96 = arith.constant dense<0.000000e+00> : vector<16x32xf32>
    %270 = tpu.matmul %267, %269, %cst_96 {dimension_numbers = #tpu.dot_dimension_numbers<[1], [0], [0], [1], [0, 0, 1, 1], [], []>} : vector<16x32xf32>, vector<32x32xf32>, vector<16x32xf32> -> vector<16x32xf32>
    %c1_97 = arith.constant 1 : index
    %c0_98 = arith.constant 0 : index
    %c0_99 = arith.constant 0 : index
    %271 = vector.load %arg10[%c1_97, %c0_98, %c0_99] : memref<2x1x32xf32, #tpu.memory_space<vmem>>, vector<1x1x32xf32>
    %272 = vector.shape_cast %271 : vector<1x1x32xf32> to vector<1x32xf32>
    %273 = vector.broadcast %272 : vector<1x32xf32> to vector<16x32xf32>
    %274 = arith.addf %270, %273 : vector<16x32xf32>
    %275 = arith.addf %179, %274 : vector<16x32xf32>
    %c1_100 = arith.constant 1 : index
    %c0_101 = arith.constant 0 : index
    %c0_102 = arith.constant 0 : index
    %276 = vector.load %arg11[%c1_100, %c0_101, %c0_102] : memref<2x1x32xf32, #tpu.memory_space<vmem>>, vector<1x1x32xf32>
    %277 = vector.shape_cast %276 : vector<1x1x32xf32> to vector<1x32xf32>
    %c1_103 = arith.constant 1 : index
    %c0_104 = arith.constant 0 : index
    %c0_105 = arith.constant 0 : index
    %278 = vector.load %arg12[%c1_103, %c0_104, %c0_105] : memref<2x1x32xf32, #tpu.memory_space<vmem>>, vector<1x1x32xf32>
    %279 = vector.shape_cast %278 : vector<1x1x32xf32> to vector<1x32xf32>
    %cst_106 = arith.constant dense<0.000000e+00> : vector<16xf32>
    %280 = vector.multi_reduction <add>, %275, %cst_106 [1] : vector<16x32xf32> to vector<16xf32>
    %281 = vector.shape_cast %280 : vector<16xf32> to vector<16x1xf32>
    %cst_107 = arith.constant 3.200000e+01 : f32
    %282 = vector.broadcast %cst_107 : f32 to vector<16x1xf32>
    %283 = arith.divf %281, %282 : vector<16x1xf32>
    %284 = vector.broadcast %283 : vector<16x1xf32> to vector<16x32xf32>
    %285 = arith.subf %275, %284 : vector<16x32xf32>
    %286 = arith.mulf %285, %285 : vector<16x32xf32>
    %cst_108 = arith.constant dense<0.000000e+00> : vector<16xf32>
    %287 = vector.multi_reduction <add>, %286, %cst_108 [1] : vector<16x32xf32> to vector<16xf32>
    %288 = vector.shape_cast %287 : vector<16xf32> to vector<16x1xf32>
    %cst_109 = arith.constant 3.200000e+01 : f32
    %289 = vector.broadcast %cst_109 : f32 to vector<16x1xf32>
    %290 = arith.divf %288, %289 : vector<16x1xf32>
    %291 = vector.broadcast %283 : vector<16x1xf32> to vector<16x32xf32>
    %292 = arith.subf %275, %291 : vector<16x32xf32>
    %cst_110 = arith.constant 9.99999974E-6 : f32
    %293 = vector.broadcast %cst_110 : f32 to vector<16x1xf32>
    %294 = arith.addf %290, %293 : vector<16x1xf32>
    %295 = math.rsqrt %294 : vector<16x1xf32>
    %296 = vector.broadcast %295 : vector<16x1xf32> to vector<16x32xf32>
    %297 = arith.mulf %292, %296 : vector<16x32xf32>
    %298 = vector.broadcast %277 : vector<1x32xf32> to vector<16x32xf32>
    %299 = arith.mulf %297, %298 : vector<16x32xf32>
    %300 = vector.broadcast %279 : vector<1x32xf32> to vector<16x32xf32>
    %301 = arith.addf %299, %300 : vector<16x32xf32>
    %c1_111 = arith.constant 1 : index
    %c0_112 = arith.constant 0 : index
    %c0_113 = arith.constant 0 : index
    %302 = vector.load %arg13[%c1_111, %c0_112, %c0_113] : memref<2x32x128xf32, #tpu.memory_space<vmem>>, vector<1x32x128xf32>
    %303 = vector.shape_cast %302 : vector<1x32x128xf32> to vector<32x128xf32>
    %cst_114 = arith.constant dense<0.000000e+00> : vector<16x128xf32>
    %304 = tpu.matmul %301, %303, %cst_114 {dimension_numbers = #tpu.dot_dimension_numbers<[1], [0], [0], [1], [0, 0, 1, 1], [], []>} : vector<16x32xf32>, vector<32x128xf32>, vector<16x128xf32> -> vector<16x128xf32>
    %c1_115 = arith.constant 1 : index
    %c0_116 = arith.constant 0 : index
    %c0_117 = arith.constant 0 : index
    %305 = vector.load %arg14[%c1_115, %c0_116, %c0_117] : memref<2x1x128xf32, #tpu.memory_space<vmem>>, vector<1x1x128xf32>
    %306 = vector.shape_cast %305 : vector<1x1x128xf32> to vector<1x128xf32>
    %307 = vector.broadcast %306 : vector<1x128xf32> to vector<16x128xf32>
    %308 = arith.addf %304, %307 : vector<16x128xf32>
    %cst_118 = arith.constant 1.702000e+00 : f32
    %309 = vector.broadcast %cst_118 : f32 to vector<16x128xf32>
    %310 = arith.mulf %309, %308 : vector<16x128xf32>
    %311 = arith.negf %310 : vector<16x128xf32>
    %312 = math.exp %311 : vector<16x128xf32>
    %cst_119 = arith.constant 1.000000e+00 : f32
    %313 = vector.broadcast %cst_119 : f32 to vector<16x128xf32>
    %314 = arith.addf %313, %312 : vector<16x128xf32>
    %315 = arith.divf %313, %314 : vector<16x128xf32>
    %316 = arith.mulf %308, %315 : vector<16x128xf32>
    %c1_120 = arith.constant 1 : index
    %c0_121 = arith.constant 0 : index
    %c0_122 = arith.constant 0 : index
    %317 = vector.load %arg15[%c1_120, %c0_121, %c0_122] : memref<2x128x32xf32, #tpu.memory_space<vmem>>, vector<1x128x32xf32>
    %318 = vector.shape_cast %317 : vector<1x128x32xf32> to vector<128x32xf32>
    %cst_123 = arith.constant dense<0.000000e+00> : vector<16x32xf32>
    %319 = tpu.matmul %316, %318, %cst_123 {dimension_numbers = #tpu.dot_dimension_numbers<[1], [0], [0], [1], [0, 0, 1, 1], [], []>} : vector<16x128xf32>, vector<128x32xf32>, vector<16x32xf32> -> vector<16x32xf32>
    %c1_124 = arith.constant 1 : index
    %c0_125 = arith.constant 0 : index
    %c0_126 = arith.constant 0 : index
    %320 = vector.load %arg16[%c1_124, %c0_125, %c0_126] : memref<2x1x32xf32, #tpu.memory_space<vmem>>, vector<1x1x32xf32>
    %321 = vector.shape_cast %320 : vector<1x1x32xf32> to vector<1x32xf32>
    %322 = vector.broadcast %321 : vector<1x32xf32> to vector<16x32xf32>
    %323 = arith.addf %319, %322 : vector<16x32xf32>
    %324 = arith.addf %275, %323 : vector<16x32xf32>
    %325 = vector.shape_cast %324 : vector<16x32xf32> to vector<2x8x32xf32>
    %326 = vector.extract_strided_slice %325 {offsets = [0, 0, 0], sizes = [2, 1, 32], strides = [1, 1, 1]} : vector<2x8x32xf32> to vector<2x1x32xf32>
    %327 = vector.shape_cast %326 : vector<2x1x32xf32> to vector<2x32xf32>
    %c0_127 = arith.constant 0 : index
    %c0_128 = arith.constant 0 : index
    %328 = vector.load %arg17[%c0_127, %c0_128] : memref<1x32xf32, #tpu.memory_space<vmem>>, vector<1x32xf32>
    %c0_129 = arith.constant 0 : index
    %c0_130 = arith.constant 0 : index
    %329 = vector.load %arg18[%c0_129, %c0_130] : memref<1x32xf32, #tpu.memory_space<vmem>>, vector<1x32xf32>
    %cst_131 = arith.constant dense<0.000000e+00> : vector<2xf32>
    %330 = vector.multi_reduction <add>, %327, %cst_131 [1] : vector<2x32xf32> to vector<2xf32>
    %331 = vector.shape_cast %330 : vector<2xf32> to vector<2x1xf32>
    %cst_132 = arith.constant 3.200000e+01 : f32
    %332 = vector.broadcast %cst_132 : f32 to vector<2x1xf32>
    %333 = arith.divf %331, %332 : vector<2x1xf32>
    %334 = vector.broadcast %333 : vector<2x1xf32> to vector<2x32xf32>
    %335 = arith.subf %327, %334 : vector<2x32xf32>
    %336 = arith.mulf %335, %335 : vector<2x32xf32>
    %cst_133 = arith.constant dense<0.000000e+00> : vector<2xf32>
    %337 = vector.multi_reduction <add>, %336, %cst_133 [1] : vector<2x32xf32> to vector<2xf32>
    %338 = vector.shape_cast %337 : vector<2xf32> to vector<2x1xf32>
    %cst_134 = arith.constant 3.200000e+01 : f32
    %339 = vector.broadcast %cst_134 : f32 to vector<2x1xf32>
    %340 = arith.divf %338, %339 : vector<2x1xf32>
    %341 = vector.broadcast %333 : vector<2x1xf32> to vector<2x32xf32>
    %342 = arith.subf %327, %341 : vector<2x32xf32>
    %cst_135 = arith.constant 9.99999974E-6 : f32
    %343 = vector.broadcast %cst_135 : f32 to vector<2x1xf32>
    %344 = arith.addf %340, %343 : vector<2x1xf32>
    %345 = math.rsqrt %344 : vector<2x1xf32>
    %346 = vector.broadcast %345 : vector<2x1xf32> to vector<2x32xf32>
    %347 = arith.mulf %342, %346 : vector<2x32xf32>
    %348 = vector.broadcast %328 : vector<1x32xf32> to vector<2x32xf32>
    %349 = arith.mulf %347, %348 : vector<2x32xf32>
    %350 = vector.broadcast %329 : vector<1x32xf32> to vector<2x32xf32>
    %351 = arith.addf %349, %350 : vector<2x32xf32>
    %c0_136 = arith.constant 0 : index
    %c0_137 = arith.constant 0 : index
    %352 = vector.load %arg19[%c0_136, %c0_137] : memref<32x16xf32, #tpu.memory_space<vmem>>, vector<32x16xf32>
    %cst_138 = arith.constant dense<0.000000e+00> : vector<2x16xf32>
    %353 = tpu.matmul %351, %352, %cst_138 {dimension_numbers = #tpu.dot_dimension_numbers<[1], [0], [0], [1], [0, 0, 1, 1], [], []>} : vector<2x32xf32>, vector<32x16xf32>, vector<2x16xf32> -> vector<2x16xf32>
    %354 = arith.mulf %353, %353 : vector<2x16xf32>
    %cst_139 = arith.constant dense<0.000000e+00> : vector<2xf32>
    %355 = vector.multi_reduction <add>, %354, %cst_139 [1] : vector<2x16xf32> to vector<2xf32>
    %356 = vector.shape_cast %355 : vector<2xf32> to vector<2x1xf32>
    %cst_140 = arith.constant 1.000000e-24 : f32
    %357 = vector.broadcast %cst_140 : f32 to vector<2x1xf32>
    %358 = arith.maximumf %356, %357 : vector<2x1xf32>
    %359 = math.rsqrt %358 : vector<2x1xf32>
    %360 = vector.broadcast %359 : vector<2x1xf32> to vector<2x16xf32>
    %361 = arith.mulf %353, %360 : vector<2x16xf32>
    %c0_141 = arith.constant 0 : index
    %c0_142 = arith.constant 0 : index
    %362 = vector.load %arg20[%c0_141, %c0_142] : memref<2x16xf32, #tpu.memory_space<vmem>>, vector<2x16xf32>
    tpu.vector_store %arg20[%c0_141, %c0_142], %361 {strides = array<i32>} : memref<2x16xf32, #tpu.memory_space<vmem>>, vector<2x16xf32>,
    return
  }
}

</mosaic_0001>

<bundles_post_ra>
// kernel: tpu_custom_call.1
= control target key start
LH: loop header
LB: loop body
LE: loop exit
PB: predicated region body
PF: predicated region fallthrough
CT: control target
= control target key end

     0   :  { %s5874_s0 = inlined_call_operand.vmem [shape: f32[16,192], index: 0, kind: input, shape index: {}]   ;;  %s5875_s1 = inlined_call_operand.vmem [shape: f32[192,32], index: 1, kind: input, shape index: {}]   ;;  %s5876_s2 = inlined_call_operand.vmem [shape: f32[16,32], index: 2, kind: input, shape index: {}]   ;;  %s5877_s3 = inlined_call_operand.vmem [shape: f32[1,32], index: 3, kind: input, shape index: {}]   ;;  %s5878_s4 = inlined_call_operand.vmem [shape: f32[1,32], index: 4, kind: input, shape index: {}]   ;;  %s5879_s5 = inlined_call_operand.vmem [shape: f32[2,1,32], index: 5, kind: input, shape index: {}]   ;;  %s5880_s6 = inlined_call_operand.vmem [shape: f32[2,1,32], index: 6, kind: input, shape index: {}]   ;;  %s5881_s7 = inlined_call_operand.vmem [shape: f32[2,32,96], index: 7, kind: input, shape index: {}]   ;;  %s5882_s8 = inlined_call_operand.vmem [shape: f32[2,1,96], index: 8, kind: input, shape index: {}]   ;;  %s5883_s9 = inlined_call_operand.vmem [shape: f32[2,32,32], index: 9, kind: input, shape index: {}]   ;;  %s5884_s10 = inlined_call_operand.vmem [shape: f32[2,1,32], index: 10, kind: input, shape index: {}]   ;;  %s5885_s11 = inlined_call_operand.vmem [shape: f32[2,1,32], index: 11, kind: input, shape index: {}]   ;;  %s5886_s12 = inlined_call_operand.vmem [shape: f32[2,1,32], index: 12, kind: input, shape index: {}]   ;;  %s5887_s13 = inlined_call_operand.vmem [shape: f32[2,32,128], index: 13, kind: input, shape index: {}]   ;;  %s5888_s14 = inlined_call_operand.vmem [shape: f32[2,1,128], index: 14, kind: input, shape index: {}]   ;;  %s5889_s15 = inlined_call_operand.vmem [shape: f32[2,128,32], index: 15, kind: input, shape index: {}]   ;;  %s5890_s16 = inlined_call_operand.vmem [shape: f32[2,1,32], index: 16, kind: input, shape index: {}]   ;;  %s5891_s17 = inlined_call_operand.vmem [shape: f32[1,32], index: 17, kind: input, shape index: {}]   ;;  %s5892_s18 = inlined_call_operand.vmem [shape: f32[1,32], index: 18, kind: input, shape index: {}]   ;;  %s5893_s19 = inlined_call_operand.vmem [shape: f32[32,16], index: 19, kind: input, shape index: {}]   ;;  %s5894_s20 = inlined_call_operand.hbm [shape: f32[2,16], index: 20, kind: output, shape index: {}]  }
   0x1   :  { %5900 = sst [smem:[#allocation5_spill]] %s5874_s0 }
   0x2   :  { %5901 = sst [smem:[#allocation6_spill]] %s5875_s1 }
   0x3   :  { %5902 = sst [smem:[#allocation7_spill]] %s5876_s2 }
   0x4   :  { %5903 = sst [smem:[#allocation8_spill]] %s5877_s3 }
   0x5   :  { %5904 = sst [smem:[#allocation9_spill]] %s5878_s4 }
   0x6   :  { %s5905_s23 = sld [smem:[#allocation6_spill]]  ;;  %v4926_v3 = vmov 0.0|0.0   ;;  %vm96_vm0 = vcmask 523264   ;;  %s5906_s25 = sld [smem:[#allocation5_spill]] }
   0x7   :  { %4631 = vmatprep.subr.bf16.mxu0 %v4926_v3 }
   0xc   :  { %v70_v0 = vld [vmem:[%s5905_s23] sm:$0xff]  ;;  %v71_v1 = vld [vmem:[%s5905_s23 + $0x8] sm:$0xff]  ;;  %v72_v2 = vld [vmem:[%s5905_s23 + $0x10] sm:$0xff] }
   0xd   :  { %v4632_v4 = vpack.c.bf16 %v71_v1, %v70_v0  ;;  %v73_v5 = vld [vmem:[%s5905_s23 + $0x18] sm:$0xff]  ;;  %v74_v7 = vld [vmem:[%s5905_s23 + $0x20] sm:$0xff]  ;;  %v75_v8 = vld [vmem:[%s5905_s23 + $0x28] sm:$0xff] }
   0xe   :  { %v4635_v6 = vpack.c.bf16 %v73_v5, %v72_v2  ;;  %v4638_v9 = vpack.c.bf16 %v75_v8, %v74_v7  ;;  %v76_v10 = vld [vmem:[%s5905_s23 + $0x30] sm:$0xff]  ;;  %v77_v11 = vld [vmem:[%s5905_s23 + $0x38] sm:$0xff]  ;;  %v67_v12 = vld [vmem:[%s5906_s25 + $0x8] sm:$0xff] }
   0xf   :  { %4633 = vmatpush1.bf16.msra.mxu0 %v4632_v4  ;;  %4060 = vmatprep.mubr.msk.f32.mxu0 %vm96_vm0, %v67_v12 }
  0x10   :  { %4634 = vmatprep.subr.bf16.mxu0 %v4926_v3 }
  0x13   :  { %4636 = vmatpush1.bf16.msra.mxu0 %v4635_v6 }
  0x14   :  { %4637 = vmatprep.subr.bf16.mxu0 %v4926_v3 }
  0x15   :  { %25 = vsyncpa [#allocation3], 0  ;;  %v4641_v13 = vpack.c.bf16 %v77_v11, %v76_v10  ;;  %v78_v14 = vld [vmem:[%s5905_s23 + $0x40] sm:$0xff]  ;;  %v79_v15 = vld [vmem:[%s5905_s23 + $0x48] sm:$0xff]  ;;  %s5907_s3 = sld [smem:[#allocation7_spill]]  ;;  %vm180_vm1 = vcmask 261120  }
  0x16   :  { %v4644_v16 = vpack.c.bf16 %v79_v15, %v78_v14  ;;  %v80_v17 = vld [vmem:[%s5905_s23 + $0x50] sm:$0xff]  ;;  %v81_v18 = vld [vmem:[%s5905_s23 + $0x58] sm:$0xff]  ;;  %v82_v20 = vld [vmem:[%s5905_s23 + $0x60] sm:$0xff]  ;;  %s5908_s4 = sld [smem:[#allocation8_spill]]  ;;  %s5909_s0 = sld [smem:[#allocation9_spill]]  ;;  %vm4928_vm2 = vmmov 0  }
  0x17   :  { %4639 = vmatpush1.bf16.msra.mxu0 %v4638_v9  ;;  %v4647_v19 = vpack.c.bf16 %v81_v18, %v80_v17  ;;  %v83_v21 = vld [vmem:[%s5905_s23 + $0x68] sm:$0xff]  ;;  %v84_v23 = vld [vmem:[%s5905_s23 + $0x70] sm:$0xff]  ;;  %v85_v24 = vld [vmem:[%s5905_s23 + $0x78] sm:$0xff]  ;;  %s4930_s21 = smov 112   ;;  %s4931_s1 = smov 104   ;;  %vm380_vm3 = vcmask 64512  }
  0x18   :  { %4640 = vmatprep.subr.bf16.mxu0 %v4926_v3  ;;  %v4650_v22 = vpack.c.bf16 %v83_v21, %v82_v20  ;;  %v4653_v25 = vpack.c.bf16 %v85_v24, %v84_v23  ;;  %v86_v26 = vld [vmem:[%s5905_s23 + $0x80] sm:$0xff]  ;;  %v87_v27 = vld [vmem:[%s5905_s23 + $0x88] sm:$0xff]  ;;  %v88_v29 = vld [vmem:[%s5905_s23 + $0x90] sm:$0xff]  ;;  %s4932_s22 = smov 96   ;;  %s4934_s24 = smov 64   ;;  %vm1709_vm5 = vcmask 130048  }
  0x19   :  { %v4656_v28 = vpack.c.bf16 %v87_v27, %v86_v26  ;;  %v89_v30 = vld [vmem:[%s5905_s23 + $0x98] sm:$0xff]  ;;  %v90_v32 = vld [vmem:[%s5905_s23 + $0xa0] sm:$0xff]  ;;  %v91_v33 = vld [vmem:[%s5905_s23 + $0xa8] sm:$0xff]  ;;  %s4935_s27 = smov 8   ;;  %s4936_s30 = smov 16   ;;  %vm1712_vm6 = vcmask 195584  }
  0x1a   :  { %v4659_v31 = vpack.c.bf16 %v89_v30, %v88_v29  ;;  %v4662_v34 = vpack.c.bf16 %v91_v33, %v90_v32  ;;  %v92_v35 = vld [vmem:[%s5905_s23 + $0xb0] sm:$0xff]  ;;  %v93_v36 = vld [vmem:[%s5905_s23 + $0xb8] sm:$0xff]  ;;  %v66_v38 = vld [vmem:[%s5906_s25] sm:$0xff]  ;;  %s5898_s23 = smov 24   ;;  %s5910_s29 = smov 24   ;;  %vm3908_vm7 = vcmask 1041409  }
  0x1b   :  { %4642 = vmatpush1.bf16.msra.mxu0 %v4641_v13  ;;  %v4665_v37 = vpack.c.bf16 %v93_v36, %v92_v35  ;;  %v69_v39 = vld [vmem:[%s5906_s25 + $0x18] sm:$0xff]  ;;  %v68_v40 = vld [vmem:[%s5906_s25 + $0x10] sm:$0xff]  ;;  %v94_v41 = vld [vmem:[%s5907_s3] sm:$0xff]  ;;  %vm3911_vm8 = vcmask 254976   ;;  %vm4038_vm9 = vcmask 123904  }
  0x1c   :  { %4643 = vmatprep.subr.bf16.mxu0 %v4926_v3  ;;  %v95_v45 = vld [vmem:[%s5907_s3 + $0x8] sm:$0xff]  ;;  %v4062_v5 = vld [vmem:[%s5908_s4] ss:$0 sm:$0xff]  ;;  %v275_v30 = vld [vmem:[%s5881_s7 + $0x18] sm:$0xff] }
  0x1d   :  { %v4063_v7 = vld [vmem:[%s5909_s0] ss:$0 sm:$0xff]  ;;  %v273_v27 = vld [vmem:[%s5881_s7 + $0x8] sm:$0xff]  ;;  %s4929_s0 = smov 120  }
  0x1e   :  { %v272_v26 = vld [vmem:[%s5881_s7] sm:$0xff] }
  0x1f   :  { %4645 = vmatpush1.bf16.msra.mxu0 %v4644_v16  ;;  %v4667_v29 = vpack.c.bf16 %v273_v27, %v272_v26 }
  0x20   :  { %4646 = vmatprep.subr.bf16.mxu0 %v4926_v3 }
  0x23   :  { %4648 = vmatpush1.bf16.msra.mxu0 %v4647_v19 }
  0x24   :  { %4649 = vmatprep.subr.bf16.mxu0 %v4926_v3 }
  0x27   :  { %4651 = vmatpush1.bf16.msra.mxu0 %v4650_v22 }
  0x28   :  { %4652 = vmatprep.subr.bf16.mxu0 %v4926_v3 }
  0x2b   :  { %4654 = vmatpush1.bf16.msra.mxu0 %v4653_v25 }
  0x2c   :  { %4655 = vmatprep.subr.bf16.mxu0 %v4926_v3 }
  0x2f   :  { %4657 = vmatpush1.bf16.msra.mxu0 %v4656_v28  ;;  %v274_v28 = vld [vmem:[%s5881_s7 + $0x10] sm:$0xff] }
  0x30   :  { %4658 = vmatprep.subr.bf16.mxu0 %v4926_v3 }
  0x33   :  { %4660 = vmatpush1.bf16.msra.mxu0 %v4659_v31  ;;  %v4671_v31 = vpack.c.bf16 %v275_v30, %v274_v28 }
  0x34   :  { %4661 = vmatprep.subr.bf16.mxu0 %v4926_v3 }
  0x37   :  { %4663 = vmatpush1.bf16.msra.mxu0 %v4662_v34 }
  0x38   :  { %4664 = vmatprep.subr.bf16.mxu0 %v4926_v3 }
  0x3b   :  { %4666 = vmatpush1.bf16.msra.mxu0 %v4665_v37 }
  0x3c   :  { %4668 = vmatprep.subr.bf16.mxu0 %v4667_v29 }
  0x3e   :  { %168 = vmatmul.mubr.f32.vlgmr.msra.gmra.mrb[0].mxu0 %v66_v38 }
  0x3f   :  { %4061 = vmatprep.mubr.msk.f32.mxu0 %vm96_vm0, %v69_v39  ;;  %4670 = vmatpush3.bf16.msra.mxu0 %v4667_v29  ;;  %v4064_v39 = vld [vmem:[%s5879_s5] ss:$0 sm:$0xff] }
  0x40   :  { %4672 = vmatprep.subr.bf16.mxu0 %v4671_v31 }
  0x42   :  { %173 = vmatmul.mubr.f32.gmra.mrb[2].mxu0 %v68_v40 }
  0x43   :  { %4674 = vmatpush3.bf16.msra.mxu0 %v4671_v31 }
 0x111   :  { %v169_v42 = vpop.f32.mrb[0].mxu0 }
 0x112   :  { %v170_v43 = vadd.f32 %v169_v42, %v94_v41  ;;  %v171_v44 = vpop.f32.mrb[1].mxu0  ;;  %v4065_v41 = vld [vmem:[%s5880_s6] ss:$0 sm:$0xff] }
 0x114   :  { %v181_v46 = vsel %vm180_vm1, %v170_v43, 0.0 }
 0x115   :  { %v174_v47 = vpop.f32.mrb[2].mxu0  ;;  %182 = vadd.xlane.f32.xlu0 %v181_v46 }
 0x116   :  { %v175_v48 = vadd.f32 %v174_v47, %v95_v45  ;;  %v176_v49 = vpop.f32.mrb[3].mxu0 }
 0x117   :  { %v4927_v49 = vmov 0.0  }
 0x118   :  { %v184_v50 = vsel %vm180_vm1, %v175_v48, 0.0  ;;  %4340 = vmatprep.subr.mxu1 %v4927_v49  ;;  %4335 = vmatprep.subr.mxu0 %v4927_v49 }
 0x119   :  { %185 = vadd.xlane.f32.xlu0 %v184_v50  ;;  %4342 = vmatprep.mubr.msk.f32.mxu1 %vm4928_vm2, %v4927_v49 }
 0x1a2   :  { %v183_v51 = vpop.xlane.xlu0 %182 }
 0x1a3   :  { %v188_v52 = vmul.f32 0.03125, %v183_v51 }
 0x1a5   :  { %v190_v53 = vsub.f32 %v170_v43, %v188_v52 }
 0x1a6   :  { %v186_v54 = vpop.xlane.xlu0 %185 }
 0x1a7   :  { %v189_v55 = vmul.f32 0.03125, %v186_v54  ;;  %v192_v56 = vmul.f32 %v190_v53, %v190_v53 }
 0x1a9   :  { %v191_v57 = vsub.f32 %v175_v48, %v189_v55  ;;  %v194_v58 = vsel %vm180_vm1, %v192_v56, 0.0  ;;  %v4066_v48 = vld [vmem:[%s5882_s8] ss:$0 sm:$0xff] }
 0x1aa   :  { %195 = vadd.xlane.f32.xlu1 %v194_v58 }
 0x1ab   :  { %v193_v59 = vmul.f32 %v191_v57, %v191_v57 }
 0x1ad   :  { %v197_v60 = vsel %vm180_vm1, %v193_v59, 0.0 }
 0x1ae   :  { %198 = vadd.xlane.f32.xlu1 %v197_v60 }
 0x237   :  { %v196_v61 = vpop.xlane.xlu1 %195 }
 0x238   :  { %v200_v62 = vmul.f32 0.03125, %v196_v61 }
 0x23a   :  { %v202_v63 = vadd.f32 1e-05, %v200_v62 }
 0x23b   :  { %v199_v0 = vpop.xlane.xlu1 %198 }
 0x23c   :  { %4798 = vrsqrt.f32 %v202_v63  ;;  %v201_v1 = vmul.f32 0.03125, %v199_v0 }
 0x23e   :  { %v203_v2 = vadd.f32 1e-05, %v201_v1 }
 0x240   :  { %4800 = vrsqrt.f32 %v203_v2 }
 0x246   :  { %v4799_v4 = vpop.eup %4798 }
 0x247   :  { %v206_v6 = vmul.f32 %v4799_v4, %v190_v53 }
 0x249   :  { %v214_v8 = vmul.f32 %v4062_v5, %v206_v6 }
 0x24a   :  { %v4801_v9 = vpop.eup %4800 }
 0x24b   :  { %v5158_v10 = vadd.f32 %v4063_v7, %v214_v8  ;;  %v207_v11 = vmul.f32 %v4801_v9, %v191_v57 }
 0x24d   :  { %v230_v12 = vsel %vm180_vm1, %v5158_v10, 0.0  ;;  %v215_v13 = vmul.f32 %v4062_v5, %v207_v11  ;;  %v224_v5 = vlaneseq }
 0x24e   :  { %231 = vadd.xlane.f32.xlu0 %v230_v12 }
 0x24f   :  { %v5162_v14 = vadd.f32 %v4063_v7, %v215_v13  ;;  %v225_v6 = vand.u32 127, %v224_v5  ;;  %v4933_v7 = vmov -1e+30  }
 0x251   :  { %v233_v15 = vsel %vm180_vm1, %v5162_v14, 0.0  ;;  %vm226_vm4 = vcmp.lt.s32.totalorder %v225_v6, 5 }
 0x252   :  { %234 = vadd.xlane.f32.xlu1 %v233_v15  ;;  %v5291_v8 = vsel %vm226_vm4, 0.0, %v4933_v7 }
 0x2db   :  { %v232_v16 = vpop.xlane.xlu0 %231 }
 0x2dc   :  { %v236_v17 = vmul.f32 0.03125, %v232_v16 }
 0x2de   :  { %v238_v18 = vsub.f32 %v5158_v10, %v236_v17 }
 0x2df   :  { %v235_v19 = vpop.xlane.xlu1 %234 }
 0x2e0   :  { %v237_v20 = vmul.f32 0.03125, %v235_v19  ;;  %v240_v21 = vmul.f32 %v238_v18, %v238_v18 }
 0x2e2   :  { %v239_v22 = vsub.f32 %v5162_v14, %v237_v20  ;;  %v242_v23 = vsel %vm180_vm1, %v240_v21, 0.0 }
 0x2e3   :  { %243 = vadd.xlane.f32.xlu0 %v242_v23 }
 0x2e4   :  { %v241_v24 = vmul.f32 %v239_v22, %v239_v22 }
 0x2e6   :  { %v245_v25 = vsel %vm180_vm1, %v241_v24, 0.0 }
 0x2e7   :  { %246 = vadd.xlane.f32.xlu1 %v245_v25 }
 0x370   :  { %v244_v32 = vpop.xlane.xlu0 %243 }
 0x371   :  { %v248_v33 = vmul.f32 0.03125, %v244_v32 }
 0x373   :  { %v250_v34 = vadd.f32 1e-05, %v248_v33 }
 0x374   :  { %v247_v35 = vpop.xlane.xlu1 %246 }
 0x375   :  { %4802 = vrsqrt.f32 %v250_v34  ;;  %v249_v36 = vmul.f32 0.03125, %v247_v35 }
 0x377   :  { %v251_v37 = vadd.f32 1e-05, %v249_v36 }
 0x379   :  { %4804 = vrsqrt.f32 %v251_v37 }
 0x37f   :  { %v4803_v38 = vpop.eup %4802 }
 0x380   :  { %v254_v40 = vmul.f32 %v4803_v38, %v238_v18 }
 0x382   :  { %v262_v42 = vmul.f32 %v4064_v39, %v254_v40 }
 0x383   :  { %v4805_v43 = vpop.eup %4804 }
 0x384   :  { %v255_v44 = vmul.f32 %v4805_v43, %v239_v22  ;;  %v270_v45 = vadd.f32 %v4065_v41, %v262_v42 }
 0x386   :  { %v263_v46 = vmul.f32 %v4064_v39, %v255_v44  ;;  %4332 = vmatprep.mubr.msk.f32.mxu0 %vm180_vm1, %v270_v45 }
 0x388   :  { %v271_v47 = vadd.f32 %v4065_v41, %v263_v46 }
 0x38a   :  { %4333 = vmatmul.mubr.msk.f32.vlgmr.msra.gmra.mrb[4].mxu0 %vm180_vm1, %v271_v47 }
 0x38b   :  { %4337 = vmatprep.mubr.msk.f32.mxu0 %vm4928_vm2, %v4927_v49 }
 0x45d   :  { %v4334_v50 = vpop.f32.mrb[4].mxu0 }
 0x45e   :  { %v5199_v51 = vadd.f32 %v4334_v50, %v4066_v48  ;;  %v355_v52 = vpop.f32.mrb[5].mxu0 }
 0x45f   :  { %v5201_v53 = vadd.f32 %v4066_v48, %v355_v52 }
 0x460   :  { %368 = vrot.lane.b32.xlu1 %v5199_v51, %s4929_s0 }
 0x461   :  { %366 = vrot.lane.b32.xlu0 %v5201_v53, %s4929_s0 }
 0x464   :  { %370 = vrot.lane.b32.xlu1 %v5201_v53, %s4930_s21 }
 0x465   :  { %374 = vrot.lane.b32.xlu0 %v5201_v53, %s4931_s1 }
 0x468   :  { %372 = vrot.lane.b32.xlu1 %v5199_v51, %s4930_s21 }
 0x469   :  { %455 = vrot.lane.b32.xlu0 %v5199_v51, %s4932_s22 }
 0x46c   :  { %376 = vrot.lane.b32.xlu1 %v5199_v51, %s4931_s1 }
 0x46d   :  { %378 = vrot.lane.b32.xlu0 %v5201_v53, %s4932_s22 }
 0x4d2   :  { %v5219_v54 = vpop.permute.xlu1 %368 }
 0x4d3   :  { %v5221_v55 = vpop.permute.xlu0 %366 }
 0x4d4   :  { %531 = vrot.lane.b32.xlu1 %v5221_v55, %s4932_s22 }
 0x4d6   :  { %v5225_v56 = vpop.permute.xlu1 %370 }
 0x4d7   :  { %683 = vrot.lane.b32.xlu0 %v5225_v56, %s4932_s22  ;;  %v5229_v57 = vpop.permute.xlu0 %374 }
 0x4d8   :  { %607 = vrot.lane.b32.xlu1 %v5219_v54, %s4932_s22 }
 0x4da   :  { %v5233_v58 = vpop.permute.xlu1 %372 }
 0x4db   :  { %835 = vrot.lane.b32.xlu0 %v5229_v57, %s4932_s22  ;;  %v456_v59 = vpop.permute.xlu0 %455 }
 0x4dc   :  { %759 = vrot.lane.b32.xlu1 %v5233_v58, %s4932_s22  ;;  %4341 = vmatpush3.xpose.msk.msra.mxu1 %vm380_vm3, %v456_v59 }
 0x4dd   :  { %4345 = vmatprep.subr.mxu1 %v4927_v49 }
 0x4de   :  { %v5241_v60 = vpop.permute.xlu1 %376 }
 0x4df   :  { %4343 = vmatmul.mubr.msk.f32.vlgmr.msra.gmra.mrb[0].mxu1 %vm380_vm3, %v5199_v51  ;;  %v379_v61 = vpop.permute.xlu0 %378 }
 0x4e0   :  { %911 = vrot.lane.b32.xlu1 %v5241_v60, %s4932_s22  ;;  %4336 = vmatpush3.xpose.msk.msra.mxu0 %vm380_vm3, %v379_v61 }
 0x4e1   :  { %4347 = vmatprep.mubr.msk.f32.mxu1 %vm4928_vm2, %v4927_v49  ;;  %4390 = vmatprep.subr.mxu0 %v4927_v49 }
 0x4e3   :  { %4338 = vmatmul.mubr.msk.f32.vlgmr.msra.gmra.mrb[6].mxu0 %vm380_vm3, %v5201_v53 }
 0x4e4   :  { %4392 = vmatprep.mubr.msk.f32.mxu0 %vm4928_vm2, %v4927_v49 }
 0x546   :  { %v532_v62 = vpop.permute.xlu1 %531 }
 0x547   :  { %4346 = vmatpush3.xpose.msk.msra.mxu1 %vm380_vm3, %v532_v62 }
 0x548   :  { %4350 = vmatprep.subr.mxu1 %v4927_v49 }
 0x549   :  { %v684_v0 = vpop.permute.xlu0 %683 }
 0x54a   :  { %v608_v63 = vpop.permute.xlu1 %607  ;;  %4348 = vmatmul.mubr.msk.f32.vlgmr.msra.gmra.mrb[2].mxu1 %vm380_vm3, %v5221_v55 }
 0x54b   :  { %4351 = vmatpush3.xpose.msk.msra.mxu1 %vm380_vm3, %v608_v63  ;;  %4352 = vmatprep.mubr.msk.f32.mxu1 %vm4928_vm2, %v4927_v49 }
 0x54c   :  { %4355 = vmatprep.subr.mxu1 %v4927_v49 }
 0x54d   :  { %v836_v2 = vpop.permute.xlu0 %835 }
 0x54e   :  { %4353 = vmatmul.mubr.msk.f32.vlgmr.msra.gmra.mrb[4].mxu1 %vm380_vm3, %v5219_v54  ;;  %v760_v1 = vpop.permute.xlu1 %759 }
 0x54f   :  { %4356 = vmatpush3.xpose.msk.msra.mxu1 %vm380_vm3, %v684_v0  ;;  %4357 = vmatprep.mubr.msk.f32.mxu1 %vm4928_vm2, %v4927_v49 }
 0x550   :  { %4360 = vmatprep.subr.mxu1 %v4927_v49 }
 0x552   :  { %4358 = vmatmul.mubr.msk.f32.vlgmr.msra.gmra.mrb[6].mxu1 %vm380_vm3, %v5225_v56  ;;  %v912_v4 = vpop.permute.xlu1 %911 }
 0x553   :  { %4361 = vmatpush3.xpose.msk.msra.mxu1 %vm380_vm3, %v760_v1  ;;  %4362 = vmatprep.mubr.msk.f32.mxu1 %vm4928_vm2, %v4927_v49 }
 0x554   :  { %4365 = vmatprep.subr.mxu1 %v4927_v49 }
 0x556   :  { %4363 = vmatmul.mubr.msk.f32.vlgmr.msra.gmra.mrb[8].mxu1 %vm380_vm3, %v5233_v58 }
 0x557   :  { %4366 = vmatpush3.xpose.msk.msra.mxu1 %vm380_vm3, %v836_v2  ;;  %4367 = vmatprep.mubr.msk.f32.mxu1 %vm4928_vm2, %v4927_v49 }
 0x558   :  { %4370 = vmatprep.subr.mxu1 %v4927_v49 }
 0x55a   :  { %4368 = vmatmul.mubr.msk.f32.vlgmr.msra.gmra.mrb[10].mxu1 %vm380_vm3, %v5229_v57 }
 0x55b   :  { %4371 = vmatpush3.xpose.msk.msra.mxu1 %vm380_vm3, %v912_v4  ;;  %4372 = vmatprep.mubr.msk.f32.mxu1 %vm4928_vm2, %v4927_v49 }
 0x55c   :  { %4375 = vmatprep.subr.mxu1 %v4927_v49 }
 0x55e   :  { %4373 = vmatmul.mubr.msk.f32.vlgmr.msra.gmra.mrb[12].mxu1 %vm380_vm3, %v5241_v60 }
 0x55f   :  { %4377 = vmatprep.mubr.msk.f32.mxu1 %vm4928_vm2, %v4927_v49 }
 0x5b2   :  { %v527_v9 = vpop.f32.mrb[0].mxu1 }
 0x5b3   :  { %v528_v11 = vadd.f32 %v527_v9, %v5291_v8  ;;  %v4344_v12 = vpop.f32.mrb[1].mxu1 }
 0x5b5   :  { %v990_v13 = vsel %vm380_vm3, %v528_v11, -inf }
 0x5b6   :  { %991 = vmax.xlane.f32.xlu1 %v990_v13  ;;  %v451_v15 = vpop.f32.mrb[6].mxu0 }
 0x5b7   :  { %v452_v16 = vadd.f32 %v451_v15, %v5291_v8  ;;  %v4339_v17 = vpop.f32.mrb[7].mxu0 }
 0x5b9   :  { %v987_v18 = vsel %vm380_vm3, %v452_v16, -inf }
 0x5ba   :  { %988 = vmax.xlane.f32.xlu0 %v987_v18 }
 0x61d   :  { %v603_v19 = vpop.f32.mrb[2].mxu1 }
 0x61e   :  { %v604_v20 = vadd.f32 %v603_v19, %v5291_v8  ;;  %v4349_v21 = vpop.f32.mrb[3].mxu1 }
 0x620   :  { %v993_v22 = vsel %vm380_vm3, %v604_v20, -inf }
 0x621   :  { %v679_v23 = vpop.f32.mrb[4].mxu1  ;;  %994 = vmax.xlane.f32.xlu0 %v993_v22 }
 0x622   :  { %v680_v24 = vadd.f32 %v679_v23, %v5291_v8  ;;  %v4354_v25 = vpop.f32.mrb[5].mxu1 }
 0x624   :  { %v996_v26 = vsel %vm380_vm3, %v680_v24, -inf }
 0x625   :  { %997 = vmax.xlane.f32.xlu0 %v996_v26  ;;  %v755_v27 = vpop.f32.mrb[6].mxu1 }
 0x626   :  { %v756_v28 = vadd.f32 %v755_v27, %v5291_v8  ;;  %v4359_v29 = vpop.f32.mrb[7].mxu1 }
 0x628   :  { %v999_v30 = vsel %vm380_vm3, %v756_v28, -inf }
 0x629   :  { %1000 = vmax.xlane.f32.xlu0 %v999_v30  ;;  %v831_v31 = vpop.f32.mrb[8].mxu1 }
 0x62a   :  { %v832_v32 = vadd.f32 %v831_v31, %v5291_v8  ;;  %v4364_v33 = vpop.f32.mrb[9].mxu1 }
 0x62c   :  { %v1002_v34 = vsel %vm380_vm3, %v832_v32, -inf }
 0x62d   :  { %1003 = vmax.xlane.f32.xlu1 %v1002_v34  ;;  %v907_v35 = vpop.f32.mrb[10].mxu1 }
 0x62e   :  { %v908_v36 = vadd.f32 %v907_v35, %v5291_v8  ;;  %v4369_v37 = vpop.f32.mrb[11].mxu1 }
 0x630   :  { %v1005_v38 = vsel %vm380_vm3, %v908_v36, -inf }
 0x631   :  { %1006 = vmax.xlane.f32.xlu0 %v1005_v38  ;;  %v983_v39 = vpop.f32.mrb[12].mxu1 }
 0x632   :  { %v984_v40 = vadd.f32 %v983_v39, %v5291_v8  ;;  %v4374_v41 = vpop.f32.mrb[13].mxu1 }
 0x634   :  { %v1008_v42 = vsel %vm380_vm3, %v984_v40, -inf }
 0x635   :  { %1009 = vmax.xlane.f32.xlu1 %v1008_v42 }
 0x643   :  { %v992_v46 = vpop.xlane.xlu1 %991 }
 0x644   :  { %v1012_v47 = vsub.f32 %v528_v11, %v992_v46 }
 0x646   :  { %1151 = vrot.lane.b32.xlu1 %v5199_v51, %s4934_s24  ;;  %v1021_v48 = vmul.f32 1.442695, %v1012_v47 }
 0x647   :  { %1075 = vrot.lane.b32.xlu0 %v5201_v53, %s4934_s24  ;;  %v989_v43 = vpop.xlane.xlu0 %988 }
 0x648   :  { %v1011_v44 = vsub.f32 %v452_v16, %v989_v43 }
 0x64a   :  { %1227 = vrot.lane.b32.xlu1 %v5221_v55, %s4934_s24  ;;  %v1019_v45 = vmul.f32 1.442695, %v1011_v44 }
 0x64b   :  { %1379 = vrot.lane.b32.xlu0 %v5225_v56, %s4934_s24 }
 0x64c   :  { %4806 = vpow2.f32 %v1019_v45 }
 0x64d   :  { %4808 = vpow2.f32 %v1021_v48 }
 0x64e   :  { %1303 = vrot.lane.b32.xlu1 %v5219_v54, %s4934_s24 }
 0x652   :  { %1455 = vrot.lane.b32.xlu1 %v5233_v58, %s4934_s24 }
 0x656   :  { %v5321_v50 = vpop.eup %4806 }
 0x657   :  { %v1035_v51 = vsel %vm380_vm3, %v5321_v50, 0.0  ;;  %v5325_v52 = vpop.eup %4808 }
 0x658   :  { %v1038_v53 = vsel %vm380_vm3, %v5325_v52, 0.0 }
 0x66a   :  { %1036 = vadd.xlane.f32.xlu0 %v1035_v51 }
 0x676   :  { %1039 = vadd.xlane.f32.xlu1 %v1038_v53 }
 0x6ae   :  { %v995_v54 = vpop.xlane.xlu0 %994 }
 0x6af   :  { %v1013_v55 = vsub.f32 %v604_v20, %v995_v54 }
 0x6b1   :  { %v1023_v56 = vmul.f32 1.442695, %v1013_v55 }
 0x6b2   :  { %v998_v58 = vpop.xlane.xlu0 %997 }
 0x6b3   :  { %4810 = vpow2.f32 %v1023_v56  ;;  %v1014_v59 = vsub.f32 %v680_v24, %v998_v58 }
 0x6b5   :  { %v1025_v61 = vmul.f32 1.442695, %v1014_v59 }
 0x6b6   :  { %v1001_v62 = vpop.xlane.xlu0 %1000 }
 0x6b7   :  { %4812 = vpow2.f32 %v1025_v61  ;;  %v1015_v63 = vsub.f32 %v756_v28, %v1001_v62 }
 0x6b9   :  { %v1027_v0 = vmul.f32 1.442695, %v1015_v63  ;;  %v1715_v63 = vld [vmem:[%s5883_s9] sm:$0xff] }
 0x6ba   :  { %v1004_v1 = vpop.xlane.xlu1 %1003 }
 0x6bb   :  { %4814 = vpow2.f32 %v1027_v0  ;;  %v1016_v2 = vsub.f32 %v832_v32, %v1004_v1  ;;  %v1716_v0 = vld [vmem:[%s5883_s9 + $0x8] sm:$0xff] }
 0x6bd   :  { %v5329_v4 = vpop.eup %4810  ;;  %v1029_v5 = vmul.f32 1.442695, %v1016_v2  ;;  %v4675_v2 = vpack.c.bf16 %v1716_v0, %v1715_v63  ;;  %v4096_v0 = vld [vmem:[%s5885_s11] ss:$0 sm:$0xff] }
 0x6be   :  { %v1007_v6 = vpop.xlane.xlu0 %1006  ;;  %v1041_v7 = vsel %vm380_vm3, %v5329_v4, 0.0 }
 0x6bf   :  { %4816 = vpow2.f32 %v1029_v5  ;;  %v1017_v9 = vsub.f32 %v908_v36, %v1007_v6  ;;  %1042 = vadd.xlane.f32.xlu0 %v1041_v7  ;;  %v1717_v5 = vld [vmem:[%s5883_s9 + $0x10] sm:$0xff]  ;;  %v1718_v6 = vld [vmem:[%s5883_s9 + $0x18] sm:$0xff] }
 0x6c1   :  { %v5333_v11 = vpop.eup %4812  ;;  %v1031_v12 = vmul.f32 1.442695, %v1017_v9  ;;  %v4679_v9 = vpack.c.bf16 %v1718_v6, %v1717_v5 }
 0x6c2   :  { %v1010_v13 = vpop.xlane.xlu1 %1009  ;;  %v1076_v15 = vpop.permute.xlu0 %1075  ;;  %v1044_v16 = vsel %vm380_vm3, %v5333_v11, 0.0 }
 0x6c3   :  { %4818 = vpow2.f32 %v1031_v12  ;;  %v1018_v17 = vsub.f32 %v984_v40, %v1010_v13  ;;  %1045 = vadd.xlane.f32.xlu1 %v1044_v16  ;;  %4376 = vmatpush3.msra.mxu1 %v1076_v15 }
 0x6c4   :  { %4380 = vmatprep.subr.mxu1 %v4927_v49 }
 0x6c5   :  { %v4815_v18 = vpop.eup %4814  ;;  %v1033_v19 = vmul.f32 1.442695, %v1018_v17 }
 0x6c6   :  { %v1152_v20 = vpop.permute.xlu1 %1151  ;;  %v1047_v21 = vsel %vm380_vm3, %v4815_v18, 0.0  ;;  %v1380_v30 = vpop.permute.xlu0 %1379 }
 0x6c7   :  { %4820 = vpow2.f32 %v1033_v19  ;;  %1048 = vadd.xlane.f32.xlu0 %v1047_v21 }
 0x6c9   :  { %v5339_v22 = vpop.eup %4816 }
 0x6ca   :  { %v1228_v23 = vpop.permute.xlu1 %1227  ;;  %v1050_v24 = vsel %vm380_vm3, %v5339_v22, 0.0 }
 0x6cb   :  { %1051 = vadd.xlane.f32.xlu1 %v1050_v24 }
 0x6cd   :  { %v5343_v25 = vpop.eup %4818 }
 0x6ce   :  { %v1304_v26 = vpop.permute.xlu1 %1303  ;;  %v1053_v27 = vsel %vm380_vm3, %v5343_v25, 0.0 }
 0x6cf   :  { %4391 = vmatpush3.msra.mxu0 %v1304_v26  ;;  %1054 = vadd.xlane.f32.xlu0 %v1053_v27 }
 0x6d0   :  { %4400 = vmatprep.subr.mxu0 %v4927_v49 }
 0x6d1   :  { %v5348_v28 = vpop.eup %4820 }
 0x6d2   :  { %v1056_v29 = vsel %vm380_vm3, %v5348_v28, 0.0  ;;  %v1456_v32 = vpop.permute.xlu1 %1455 }
 0x6d3   :  { %1057 = vadd.xlane.f32.xlu1 %v1056_v29 }
 0x6e4   :  { %1607 = vrot.lane.b32.xlu1 %v5241_v60, %s4934_s24 }
 0x6e5   :  { %1531 = vrot.lane.b32.xlu0 %v5229_v57, %s4934_s24 }
 0x6f7   :  { %v1037_v31 = vpop.xlane.xlu0 %1036 }
 0x6f8   :  { %4822 = vrcp.f32 %v1037_v31 }
 0x702   :  { %v4823_v33 = vpop.eup %4822 }
 0x703   :  { %v1067_v34 = vmul.f32 %v4823_v33, %v5321_v50  ;;  %v1040_v35 = vpop.xlane.xlu1 %1039  ;;  %v4093_v33 = vld [vmem:[%s5884_s10] ss:$0 sm:$0xff] }
 0x704   :  { %4824 = vrcp.f32 %v1040_v35 }
 0x705   :  { %4378 = vmatmul.mubr.msk.f32.vlgmr.msra.gmra.mrb[14].mxu1 %vm380_vm3, %v1067_v34 }
 0x706   :  { %4381 = vmatpush3.msra.mxu1 %v1152_v20  ;;  %4382 = vmatprep.mubr.msk.f32.mxu1 %vm4928_vm2, %v4927_v49 }
 0x707   :  { %4385 = vmatprep.subr.mxu1 %v4927_v49 }
 0x70e   :  { %v4825_v60 = vpop.eup %4824 }
 0x70f   :  { %v1068_v57 = vmul.f32 %v4825_v60, %v5325_v52 }
 0x711   :  { %4383 = vmatmul.mubr.msk.f32.vlgmr.msra.gmra.mrb[16].mxu1 %vm380_vm3, %v1068_v57 }
 0x712   :  { %4386 = vmatpush3.msra.mxu1 %v1228_v23  ;;  %4387 = vmatprep.mubr.msk.f32.mxu1 %vm4928_vm2, %v4927_v49 }
 0x713   :  { %4395 = vmatprep.subr.mxu1 %v4927_v49 }
 0x74c   :  { %v1043_v36 = vpop.xlane.xlu0 %1042 }
 0x74d   :  { %4826 = vrcp.f32 %v1043_v36 }
 0x750   :  { %v1046_v37 = vpop.xlane.xlu1 %1045 }
 0x751   :  { %4828 = vrcp.f32 %v1046_v37 }
 0x754   :  { %v1049_v38 = vpop.xlane.xlu0 %1048 }
 0x755   :  { %4830 = vrcp.f32 %v1049_v38 }
 0x757   :  { %v4827_v39 = vpop.eup %4826 }
 0x758   :  { %v1069_v40 = vmul.f32 %v4827_v39, %v5329_v4  ;;  %v1052_v41 = vpop.xlane.xlu1 %1051 }
 0x759   :  { %4832 = vrcp.f32 %v1052_v41 }
 0x75a   :  { %4388 = vmatmul.mubr.msk.f32.vlgmr.msra.gmra.mrb[18].mxu1 %vm380_vm3, %v1069_v40 }
 0x75b   :  { %v4829_v42 = vpop.eup %4828  ;;  %4396 = vmatpush3.msra.mxu1 %v1380_v30  ;;  %4397 = vmatprep.mubr.msk.f32.mxu1 %vm4928_vm2, %v4927_v49 }
 0x75c   :  { %v1070_v43 = vmul.f32 %v4829_v42, %v5333_v11  ;;  %v1055_v44 = vpop.xlane.xlu0 %1054  ;;  %4405 = vmatprep.subr.mxu1 %v4927_v49 }
 0x75d   :  { %4834 = vrcp.f32 %v1055_v44 }
 0x75e   :  { %4393 = vmatmul.mubr.msk.f32.vlgmr.msra.gmra.mrb[8].mxu0 %vm380_vm3, %v1070_v43 }
 0x75f   :  { %v4831_v45 = vpop.eup %4830  ;;  %4401 = vmatpush3.msra.mxu0 %v1456_v32  ;;  %4402 = vmatprep.mubr.msk.f32.mxu0 %vm4928_vm2, %v4927_v49 }
 0x760   :  { %v1071_v46 = vmul.f32 %v4831_v45, %v4815_v18  ;;  %v1058_v47 = vpop.xlane.xlu1 %1057  ;;  %v1532_v48 = vpop.permute.xlu0 %1531  ;;  %4410 = vmatprep.subr.mxu0 %v4927_v49 }
 0x761   :  { %4836 = vrcp.f32 %v1058_v47 }
 0x762   :  { %4398 = vmatmul.mubr.msk.f32.vlgmr.msra.gmra.mrb[20].mxu1 %vm380_vm3, %v1071_v46 }
 0x763   :  { %v4833_v50 = vpop.eup %4832  ;;  %4406 = vmatpush3.msra.mxu1 %v1532_v48  ;;  %4407 = vmatprep.mubr.msk.f32.mxu1 %vm4928_vm2, %v4927_v49  ;;  %v1853_v48 = vld [vmem:[%s5887_s13] sm:$0xff] }
 0x764   :  { %v1072_v51 = vmul.f32 %v4833_v50, %v5339_v22  ;;  %v1608_v52 = vpop.permute.xlu1 %1607  ;;  %4676 = vmatprep.subr.bf16.mxu1 %v4675_v2  ;;  %v1854_v50 = vld [vmem:[%s5887_s13 + $0x8] sm:$0xff] }
 0x766   :  { %4403 = vmatmul.mubr.msk.f32.vlgmr.msra.gmra.mrb[10].mxu0 %vm380_vm3, %v1072_v51  ;;  %v4683_v51 = vpack.c.bf16 %v1854_v50, %v1853_v48 }
 0x767   :  { %v4835_v53 = vpop.eup %4834  ;;  %4411 = vmatpush3.msra.mxu0 %v1608_v52  ;;  %4412 = vmatprep.mubr.msk.f32.mxu0 %vm4928_vm2, %v4927_v49  ;;  %v1855_v52 = vld [vmem:[%s5887_s13 + $0x10] sm:$0xff] }
 0x768   :  { %v1073_v54 = vmul.f32 %v4835_v53, %v5343_v25  ;;  %4684 = vmatprep.subr.bf16.mxu0 %v4683_v51  ;;  %v1856_v53 = vld [vmem:[%s5887_s13 + $0x18] sm:$0xff] }
 0x76a   :  { %4408 = vmatmul.mubr.msk.f32.vlgmr.msra.gmra.mrb[22].mxu1 %vm380_vm3, %v1073_v54  ;;  %v4687_v54 = vpack.c.bf16 %v1856_v53, %v1855_v52  ;;  %v4103_v53 = vld [vmem:[%s5890_s16] ss:$0 sm:$0xff] }
 0x76b   :  { %v4837_v55 = vpop.eup %4836  ;;  %4678 = vmatpush3.bf16.msra.mxu1 %v4675_v2  ;;  %v4097_v2 = vld [vmem:[%s5886_s12] ss:$0 sm:$0xff] }
 0x76c   :  { %v1074_v56 = vmul.f32 %v4837_v55, %v5348_v28  ;;  %4680 = vmatprep.subr.bf16.mxu1 %v4679_v9 }
 0x76e   :  { %4413 = vmatmul.mubr.msk.f32.vlgmr.msra.gmra.mrb[12].mxu0 %vm380_vm3, %v1074_v56 }
 0x76f   :  { %4682 = vmatpush3.bf16.msra.mxu1 %v4679_v9  ;;  %4686 = vmatpush3.bf16.msra.mxu0 %v4683_v51 }
 0x770   :  { %4688 = vmatprep.subr.bf16.mxu0 %v4687_v54 }
 0x773   :  { %4690 = vmatpush3.bf16.msra.mxu0 %v4687_v54 }
 0x7d8   :  { %v1147_v58 = vpop.f32.mrb[14].mxu1 }
 0x7d9   :  { %v4379_v59 = vpop.f32.mrb[15].mxu1 }
 0x7e4   :  { %v1223_v61 = vpop.f32.mrb[16].mxu1 }
 0x7e5   :  { %v4384_v62 = vpop.f32.mrb[17].mxu1 }
 0x82d   :  { %v1299_v1 = vpop.f32.mrb[18].mxu1 }
 0x82e   :  { %1685 = vrot.lane.b32.xlu0 %v1299_v1, %s4935_s27  ;;  %v4389_v4 = vpop.f32.mrb[19].mxu1 }
 0x831   :  { %v1375_v7 = vpop.f32.mrb[8].mxu0 }
 0x832   :  { %1687 = vrot.lane.b32.xlu1 %v1375_v7, %s4935_s27  ;;  %v4394_v11 = vpop.f32.mrb[9].mxu0 }
 0x835   :  { %v1451_v12 = vpop.f32.mrb[20].mxu1 }
 0x836   :  { %1693 = vrot.lane.b32.xlu0 %v1451_v12, %s4936_s30  ;;  %v4399_v13 = vpop.f32.mrb[21].mxu1  ;;  %v1961_v12 = vld [vmem:[%s5889_s15] sm:$0xff] }
 0x837   :  { %v1962_v13 = vld [vmem:[%s5889_s15 + $0x8] sm:$0xff] }
 0x839   :  { %v1527_v15 = vpop.f32.mrb[10].mxu0 }
 0x83a   :  { %1695 = vrot.lane.b32.xlu1 %v1527_v15, %s4936_s30  ;;  %v4404_v16 = vpop.f32.mrb[11].mxu0  ;;  %v4691_v15 = vpack.c.bf16 %v1962_v13, %v1961_v12  ;;  %v4109_v12 = vld [vmem:[%s5881_s7 + $0x28] sm:$0xff] }
 0x83b   :  { %v1963_v16 = vld [vmem:[%s5889_s15 + $0x10] sm:$0xff] }
 0x83c   :  { %4692 = vmatprep.subr.bf16.mxu1 %v4691_v15 }
 0x83d   :  { %v1603_v17 = vpop.f32.mrb[22].mxu1 }
 0x83e   :  { %1701 = vrot.lane.b32.xlu0 %v1603_v17, %s5898_s23  ;;  %v4409_v18 = vpop.f32.mrb[23].mxu1  ;;  %v1964_v17 = vld [vmem:[%s5889_s15 + $0x18] sm:$0xff] }
 0x83f   :  { %v4695_v18 = vpack.c.bf16 %v1964_v17, %v1963_v16  ;;  %v4111_v16 = vld [vmem:[%s5881_s7 + $0x38] sm:$0xff] }
 0x841   :  { %v1679_v19 = vpop.f32.mrb[12].mxu0 }
 0x842   :  { %1703 = vrot.lane.b32.xlu1 %v1679_v19, %s5898_s23  ;;  %v4414_v20 = vpop.f32.mrb[13].mxu0  ;;  %v1965_v19 = vld [vmem:[%s5889_s15 + $0x20] sm:$0xff] }
 0x843   :  { %v1966_v20 = vld [vmem:[%s5889_s15 + $0x28] sm:$0xff] }
 0x8a0   :  { %v1686_v21 = vpop.permute.xlu0 %1685 }
 0x8a1   :  { %v1707_v24 = vsel %vm380_vm3, %v1147_v58, %v1686_v21  ;;  %v4699_v21 = vpack.c.bf16 %v1966_v20, %v1965_v19 }
 0x8a4   :  { %v1688_v22 = vpop.permute.xlu1 %1687 }
 0x8a5   :  { %v1708_v29 = vsel %vm380_vm3, %v1223_v61, %v1688_v22  ;;  %v1967_v22 = vld [vmem:[%s5889_s15 + $0x30] sm:$0xff] }
 0x8a8   :  { %v1694_v23 = vpop.permute.xlu0 %1693 }
 0x8a9   :  { %v1710_v25 = vsel %vm1709_vm5, %v1707_v24, %v1694_v23  ;;  %v1968_v23 = vld [vmem:[%s5889_s15 + $0x38] sm:$0xff] }
 0x8aa   :  { %v4703_v24 = vpack.c.bf16 %v1968_v23, %v1967_v22 }
 0x8ac   :  { %v1696_v26 = vpop.permute.xlu1 %1695 }
 0x8ad   :  { %v1711_v30 = vsel %vm1709_vm5, %v1708_v29, %v1696_v26  ;;  %v1970_v26 = vld [vmem:[%s5889_s15 + $0x48] sm:$0xff]  ;;  %v1972_v29 = vld [vmem:[%s5889_s15 + $0x58] sm:$0xff] }
 0x8b0   :  { %v1702_v27 = vpop.permute.xlu0 %1701 }
 0x8b1   :  { %v1713_v28 = vsel %vm1712_vm6, %v1710_v25, %v1702_v27  ;;  %v1969_v25 = vld [vmem:[%s5889_s15 + $0x40] sm:$0xff] }
 0x8b2   :  { %4423 = vmatprep.mubr.msk.f32.mxu1 %vm180_vm1, %v1713_v28  ;;  %v4707_v27 = vpack.c.bf16 %v1970_v26, %v1969_v25  ;;  %v1971_v28 = vld [vmem:[%s5889_s15 + $0x50] sm:$0xff]  ;;  %v4106_v25 = vld [vmem:[%s5879_s5 + $0x1] ss:$0 sm:$0xff] }
 0x8b4   :  { %v1704_v31 = vpop.permute.xlu1 %1703 }
 0x8b5   :  { %v1714_v32 = vsel %vm1712_vm6, %v1711_v30, %v1704_v31  ;;  %v4711_v30 = vpack.c.bf16 %v1972_v29, %v1971_v28  ;;  %v1973_v31 = vld [vmem:[%s5889_s15 + $0x60] sm:$0xff] }
 0x8b6   :  { %4424 = vmatmul.mubr.msk.f32.vlgmr.msra.gmra.mrb[24].mxu1 %vm180_vm1, %v1714_v32  ;;  %v1974_v32 = vld [vmem:[%s5889_s15 + $0x68] sm:$0xff]  ;;  %v4107_v29 = vld [vmem:[%s5880_s6 + $0x1] ss:$0 sm:$0xff] }
 0x8b7   :  { %4694 = vmatpush3.bf16.msra.mxu1 %v4691_v15  ;;  %v4110_v15 = vld [vmem:[%s5881_s7 + $0x30] sm:$0xff] }
 0x8b8   :  { %4696 = vmatprep.subr.bf16.mxu1 %v4695_v18  ;;  %v4727_v17 = vpack.c.bf16 %v4111_v16, %v4110_v15 }
 0x8bb   :  { %4698 = vmatpush3.bf16.msra.mxu1 %v4695_v18 }
 0x8bc   :  { %4700 = vmatprep.subr.bf16.mxu1 %v4699_v21 }
 0x8bf   :  { %4702 = vmatpush3.bf16.msra.mxu1 %v4699_v21 }
 0x8c0   :  { %4704 = vmatprep.subr.bf16.mxu1 %v4703_v24 }
 0x8c3   :  { %4706 = vmatpush3.bf16.msra.mxu1 %v4703_v24 }
 0x8c4   :  { %4708 = vmatprep.subr.bf16.mxu1 %v4707_v27 }
 0x8c7   :  { %4710 = vmatpush3.bf16.msra.mxu1 %v4707_v27 }
 0x8c8   :  { %4712 = vmatprep.subr.bf16.mxu1 %v4711_v30 }
 0x8cb   :  { %4714 = vmatpush3.bf16.msra.mxu1 %v4711_v30 }
 0x989   :  { %v4425_v34 = vpop.f32.mrb[24].mxu1 }
 0x98a   :  { %v1804_v35 = vadd.f32 %v4425_v34, %v4093_v33  ;;  %v1798_v60 = vpop.f32.mrb[25].mxu1  ;;  %v1975_v34 = vld [vmem:[%s5889_s15 + $0x70] sm:$0xff] }
 0x98b   :  { %v1799_v57 = vadd.f32 %v4093_v33, %v1798_v60  ;;  %v4715_v33 = vpack.c.bf16 %v1974_v32, %v1973_v31 }
 0x98c   :  { %v5417_v36 = vadd.f32 %v1804_v35, %v5162_v14  ;;  %v1976_v35 = vld [vmem:[%s5889_s15 + $0x78] sm:$0xff] }
 0x98d   :  { %v5420_v37 = vadd.f32 %v1799_v57, %v5158_v10  ;;  %4716 = vmatprep.subr.bf16.mxu1 %v4715_v33  ;;  %v4719_v60 = vpack.c.bf16 %v1976_v35, %v1975_v34  ;;  %v4098_v57 = vld [vmem:[%s5888_s14] ss:$0 sm:$0xff]  ;;  %v4113_v34 = vld [vmem:[%s5882_s8 + $0x1] ss:$0 sm:$0xff] }
 0x98e   :  { %v1814_v38 = vsel %vm180_vm1, %v5417_v36, 0.0  ;;  %4718 = vmatpush3.bf16.msra.mxu1 %v4715_v33 }
 0x98f   :  { %1815 = vadd.xlane.f32.xlu1 %v1814_v38  ;;  %v1811_v39 = vsel %vm180_vm1, %v5420_v37, 0.0  ;;  %4720 = vmatprep.subr.bf16.mxu1 %v4719_v60 }
 0x990   :  { %1812 = vadd.xlane.f32.xlu0 %v1811_v39 }
 0x992   :  { %4722 = vmatpush3.bf16.msra.mxu1 %v4719_v60 }
 0x993   :  { %4513 = vmatprep.subr.mxu1 %v4927_v49 }
 0xa1c   :  { %v1816_v40 = vpop.xlane.xlu1 %1815 }
 0xa1d   :  { %v1818_v41 = vmul.f32 0.03125, %v1816_v40  ;;  %v1813_v42 = vpop.xlane.xlu0 %1812 }
 0xa1e   :  { %v1817_v43 = vmul.f32 0.03125, %v1813_v42 }
 0xa1f   :  { %v1820_v44 = vsub.f32 %v5417_v36, %v1818_v41 }
 0xa20   :  { %v1819_v14 = vsub.f32 %v5420_v37, %v1817_v43 }
 0xa21   :  { %v1822_v46 = vmul.f32 %v1820_v44, %v1820_v44 }
 0xa22   :  { %v1821_v45 = vmul.f32 %v1819_v14, %v1819_v14 }
 0xa23   :  { %v1826_v47 = vsel %vm180_vm1, %v1822_v46, 0.0 }
 0xa24   :  { %v1823_v10 = vsel %vm180_vm1, %v1821_v45, 0.0 }
 0xa25   :  { %1824 = vadd.xlane.f32.xlu0 %v1823_v10 }
 0xa29   :  { %1827 = vadd.xlane.f32.xlu0 %v1826_v47 }
 0xab2   :  { %v1825_v55 = vpop.xlane.xlu0 %1824 }
 0xab3   :  { %v1829_v56 = vmul.f32 0.03125, %v1825_v55 }
 0xab5   :  { %v1831_v58 = vadd.f32 1e-05, %v1829_v56 }
 0xab6   :  { %v1828_v59 = vpop.xlane.xlu0 %1827 }
 0xab7   :  { %4838 = vrsqrt.f32 %v1831_v58  ;;  %v1830_v61 = vmul.f32 0.03125, %v1828_v59 }
 0xab9   :  { %v1832_v62 = vadd.f32 1e-05, %v1830_v61 }
 0xabb   :  { %4840 = vrsqrt.f32 %v1832_v62 }
 0xac1   :  { %v4839_v63 = vpop.eup %4838 }
 0xac2   :  { %v1835_v1 = vmul.f32 %v4839_v63, %v1819_v14 }
 0xac4   :  { %v1843_v4 = vmul.f32 %v4096_v0, %v1835_v1 }
 0xac5   :  { %v4841_v5 = vpop.eup %4840 }
 0xac6   :  { %v1836_v6 = vmul.f32 %v4841_v5, %v1820_v44  ;;  %v1851_v7 = vadd.f32 %v4097_v2, %v1843_v4 }
 0xac8   :  { %v1844_v9 = vmul.f32 %v4096_v0, %v1836_v6  ;;  %4434 = vmatprep.mubr.msk.f32.mxu0 %vm180_vm1, %v1851_v7 }
 0xaca   :  { %v1852_v11 = vadd.f32 %v4097_v2, %v1844_v9 }
 0xacc   :  { %4435 = vmatmul.mubr.msk.f32.vlgmr.msra.gmra.mrb[14].mxu0 %vm180_vm1, %v1852_v11  ;;  %v4108_v11 = vld [vmem:[%s5881_s7 + $0x20] sm:$0xff] }
 0xacd   :  { %v4723_v13 = vpack.c.bf16 %v4109_v12, %v4108_v11 }
 0xacf   :  { %4724 = vmatprep.subr.bf16.mxu0 %v4723_v13 }
 0xad0   :  { %4726 = vmatpush3.bf16.msra.mxu0 %v4723_v13 }
 0xad1   :  { %4728 = vmatprep.subr.bf16.mxu0 %v4727_v17 }
 0xad4   :  { %4730 = vmatpush3.bf16.msra.mxu0 %v4727_v17 }
 0xad5   :  { %4483 = vmatprep.subr.mxu0 %v4927_v49 }
 0xb9f   :  { %v4436_v38 = vpop.f32.mrb[14].mxu0 }
 0xba0   :  { %v1942_v39 = vadd.f32 %v4436_v38, %v4098_v57  ;;  %v1936_v40 = vpop.f32.mrb[15].mxu0 }
 0xba1   :  { %v1937_v41 = vadd.f32 %v4098_v57, %v1936_v40 }
 0xba2   :  { %v4102_v42 = vmul.f32 -1.702, %v1942_v39 }
 0xba3   :  { %v4101_v43 = vmul.f32 -1.702, %v1937_v41 }
 0xba4   :  { %v1951_v44 = vmul.f32 1.442695, %v4102_v42 }
 0xba5   :  { %v1949_v14 = vmul.f32 1.442695, %v4101_v43 }
 0xba6   :  { %4842 = vpow2.f32 %v1951_v44 }
 0xba7   :  { %4844 = vpow2.f32 %v1949_v14 }
 0xbb0   :  { %v4843_v45 = vpop.eup %4842 }
 0xbb1   :  { %v4845_v10 = vpop.eup %4844  ;;  %v1954_v46 = vadd.f32 1.0, %v4843_v45 }
 0xbb2   :  { %v1953_v47 = vadd.f32 1.0, %v4845_v10 }
 0xbb3   :  { %4846 = vrcp.f32 %v1954_v46 }
 0xbb4   :  { %4848 = vrcp.f32 %v1953_v47 }
 0xbbd   :  { %v4847_v48 = vpop.eup %4846 }
 0xbbe   :  { %v4849_v50 = vpop.eup %4848  ;;  %v1960_v52 = vmul.f32 %v4847_v48, %v1942_v39 }
 0xbbf   :  { %v1959_v51 = vmul.f32 %v4849_v50, %v1937_v41 }
 0xbc1   :  { %4469 = vmatprep.mubr.f32.mxu1 %v1959_v51 }
 0xbc2   :  { %4470 = vmatmul.mubr.f32.vlgmr.msra.gmra.mrb[26].mxu1 %v1960_v52 }
 0xbc3   :  { %4515 = vmatprep.mubr.msk.f32.mxu1 %vm4928_vm2, %v4927_v49 }
 0xc95   :  { %v4471_v54 = vpop.f32.mrb[26].mxu1 }
 0xc96   :  { %v2056_v55 = vadd.f32 %v4471_v54, %v4103_v53  ;;  %v2050_v56 = vpop.f32.mrb[27].mxu1 }
 0xc97   :  { %v2051_v58 = vadd.f32 %v4103_v53, %v2050_v56 }
 0xc98   :  { %v5508_v59 = vadd.f32 %v2056_v55, %v5417_v36 }
 0xc99   :  { %v5511_v61 = vadd.f32 %v2051_v58, %v5420_v37 }
 0xc9a   :  { %v2068_v62 = vsel %vm180_vm1, %v5508_v59, 0.0 }
 0xc9b   :  { %2069 = vadd.xlane.f32.xlu1 %v2068_v62  ;;  %v2065_v63 = vsel %vm180_vm1, %v5511_v61, 0.0 }
 0xc9c   :  { %2066 = vadd.xlane.f32.xlu0 %v2065_v63 }
 0xd28   :  { %v2070_v0 = vpop.xlane.xlu1 %2069 }
 0xd29   :  { %v2072_v1 = vmul.f32 0.03125, %v2070_v0  ;;  %v2067_v2 = vpop.xlane.xlu0 %2066 }
 0xd2a   :  { %v2071_v4 = vmul.f32 0.03125, %v2067_v2 }
 0xd2b   :  { %v2074_v5 = vsub.f32 %v5508_v59, %v2072_v1 }
 0xd2c   :  { %v2073_v36 = vsub.f32 %v5511_v61, %v2071_v4 }
 0xd2d   :  { %v2076_v6 = vmul.f32 %v2074_v5, %v2074_v5 }
 0xd2e   :  { %v2075_v7 = vmul.f32 %v2073_v36, %v2073_v36 }
 0xd2f   :  { %v2080_v37 = vsel %vm180_vm1, %v2076_v6, 0.0 }
 0xd30   :  { %2081 = vadd.xlane.f32.xlu1 %v2080_v37  ;;  %v2077_v9 = vsel %vm180_vm1, %v2075_v7, 0.0 }
 0xd31   :  { %2078 = vadd.xlane.f32.xlu0 %v2077_v9 }
 0xdbd   :  { %v2082_v18 = vpop.xlane.xlu1 %2081 }
 0xdbe   :  { %v2084_v19 = vmul.f32 0.03125, %v2082_v18  ;;  %v2079_v20 = vpop.xlane.xlu0 %2078 }
 0xdbf   :  { %v2083_v21 = vmul.f32 0.03125, %v2079_v20 }
 0xdc0   :  { %v2086_v22 = vadd.f32 1e-05, %v2084_v19 }
 0xdc1   :  { %v2085_v23 = vadd.f32 1e-05, %v2083_v21 }
 0xdc2   :  { %4850 = vrsqrt.f32 %v2086_v22 }
 0xdc3   :  { %4852 = vrsqrt.f32 %v2085_v23 }
 0xdcc   :  { %v4851_v24 = vpop.eup %4850 }
 0xdcd   :  { %v4853_v26 = vpop.eup %4852  ;;  %v2090_v27 = vmul.f32 %v4851_v24, %v2074_v5 }
 0xdce   :  { %v2089_v28 = vmul.f32 %v4853_v26, %v2073_v36 }
 0xdcf   :  { %v2098_v30 = vmul.f32 %v4106_v25, %v2090_v27 }
 0xdd0   :  { %v2097_v31 = vmul.f32 %v4106_v25, %v2089_v28 }
 0xdd1   :  { %v2106_v33 = vadd.f32 %v4107_v29, %v2098_v30 }
 0xdd2   :  { %v2105_v32 = vadd.f32 %v4107_v29, %v2097_v31 }
 0xdd4   :  { %4480 = vmatprep.mubr.msk.f32.mxu0 %vm180_vm1, %v2105_v32 }
 0xdd5   :  { %4481 = vmatmul.mubr.msk.f32.vlgmr.msra.gmra.mrb[16].mxu0 %vm180_vm1, %v2106_v33 }
 0xdd6   :  { %4485 = vmatprep.mubr.msk.f32.mxu0 %vm4928_vm2, %v4927_v49 }
 0xea8   :  { %v4482_v35 = vpop.f32.mrb[16].mxu0 }
 0xea9   :  { %v5547_v60 = vadd.f32 %v4482_v35, %v4113_v34  ;;  %v2192_v57 = vpop.f32.mrb[17].mxu0 }
 0xeaa   :  { %v5549_v38 = vadd.f32 %v4113_v34, %v2192_v57 }
 0xeab   :  { %2205 = vrot.lane.b32.xlu1 %v5547_v60, %s4929_s0 }
 0xeac   :  { %2203 = vrot.lane.b32.xlu0 %v5549_v38, %s4929_s0 }
 0xeaf   :  { %2207 = vrot.lane.b32.xlu1 %v5549_v38, %s4930_s21 }
 0xeb0   :  { %2211 = vrot.lane.b32.xlu0 %v5549_v38, %s4931_s1 }
 0xeb3   :  { %2209 = vrot.lane.b32.xlu1 %v5547_v60, %s4930_s21 }
 0xeb4   :  { %2215 = vrot.lane.b32.xlu0 %v5549_v38, %s4932_s22 }
 0xeb7   :  { %2213 = vrot.lane.b32.xlu1 %v5547_v60, %s4931_s1 }
 0xebb   :  { %2291 = vrot.lane.b32.xlu1 %v5547_v60, %s4932_s22 }
 0xf1d   :  { %v5567_v39 = vpop.permute.xlu1 %2205 }
 0xf1e   :  { %2443 = vrot.lane.b32.xlu1 %v5567_v39, %s4932_s22  ;;  %v5571_v40 = vpop.permute.xlu0 %2203 }
 0xf1f   :  { %2367 = vrot.lane.b32.xlu0 %v5571_v40, %s4932_s22 }
 0xf21   :  { %v5575_v41 = vpop.permute.xlu1 %2207 }
 0xf22   :  { %v5577_v42 = vpop.permute.xlu0 %2211 }
 0xf23   :  { %2519 = vrot.lane.b32.xlu0 %v5575_v41, %s4932_s22 }
 0xf25   :  { %v5581_v43 = vpop.permute.xlu1 %2209 }
 0xf26   :  { %2595 = vrot.lane.b32.xlu1 %v5581_v43, %s4932_s22  ;;  %v2216_v44 = vpop.permute.xlu0 %2215 }
 0xf27   :  { %2671 = vrot.lane.b32.xlu0 %v5577_v42, %s4932_s22  ;;  %4484 = vmatpush3.xpose.msk.msra.mxu0 %vm380_vm3, %v2216_v44 }
 0xf28   :  { %4488 = vmatprep.subr.mxu0 %v4927_v49 }
 0xf29   :  { %v5589_v14 = vpop.permute.xlu1 %2213 }
 0xf2a   :  { %2747 = vrot.lane.b32.xlu1 %v5589_v14, %s4932_s22  ;;  %4486 = vmatmul.mubr.msk.f32.vlgmr.msra.gmra.mrb[18].mxu0 %vm380_vm3, %v5549_v38 }
 0xf2b   :  { %4490 = vmatprep.mubr.msk.f32.mxu0 %vm4928_vm2, %v4927_v49 }
 0xf2d   :  { %v2292_v45 = vpop.permute.xlu1 %2291 }
 0xf2e   :  { %4489 = vmatpush3.xpose.msk.msra.mxu0 %vm380_vm3, %v2292_v45 }
 0xf2f   :  { %4493 = vmatprep.subr.mxu0 %v4927_v49 }
 0xf31   :  { %4491 = vmatmul.mubr.msk.f32.vlgmr.msra.gmra.mrb[20].mxu0 %vm380_vm3, %v5547_v60 }
 0xf32   :  { %4495 = vmatprep.mubr.msk.f32.mxu0 %vm4928_vm2, %v4927_v49 }
 0xf90   :  { %v2444_v46 = vpop.permute.xlu1 %2443 }
 0xf91   :  { %v2368_v10 = vpop.permute.xlu0 %2367 }
 0xf92   :  { %4494 = vmatpush3.xpose.msk.msra.mxu0 %vm380_vm3, %v2368_v10 }
 0xf93   :  { %4498 = vmatprep.subr.mxu0 %v4927_v49 }
 0xf95   :  { %4496 = vmatmul.mubr.msk.f32.vlgmr.msra.gmra.mrb[22].mxu0 %vm380_vm3, %v5571_v40  ;;  %v2520_v47 = vpop.permute.xlu0 %2519 }
 0xf96   :  { %4499 = vmatpush3.xpose.msk.msra.mxu0 %vm380_vm3, %v2444_v46  ;;  %4500 = vmatprep.mubr.msk.f32.mxu0 %vm4928_vm2, %v4927_v49 }
 0xf97   :  { %4503 = vmatprep.subr.mxu0 %v4927_v49 }
 0xf98   :  { %v2596_v50 = vpop.permute.xlu1 %2595 }
 0xf99   :  { %4501 = vmatmul.mubr.msk.f32.vlgmr.msra.gmra.mrb[24].mxu0 %vm380_vm3, %v5567_v39  ;;  %v2672_v48 = vpop.permute.xlu0 %2671 }
 0xf9a   :  { %4504 = vmatpush3.xpose.msk.msra.mxu0 %vm380_vm3, %v2520_v47  ;;  %4514 = vmatpush3.xpose.msk.msra.mxu1 %vm380_vm3, %v2672_v48 }
 0xf9b   :  { %4505 = vmatprep.mubr.msk.f32.mxu0 %vm4928_vm2, %v4927_v49  ;;  %4508 = vmatprep.subr.mxu0 %v4927_v49 }
 0xf9c   :  { %4523 = vmatprep.subr.mxu1 %v4927_v49  ;;  %v2748_v51 = vpop.permute.xlu1 %2747 }
 0xf9d   :  { %4506 = vmatmul.mubr.msk.f32.vlgmr.msra.gmra.mrb[26].mxu0 %vm380_vm3, %v5575_v41  ;;  %4516 = vmatmul.mubr.msk.f32.vlgmr.msra.gmra.mrb[28].mxu1 %vm380_vm3, %v5577_v42 }
 0xf9e   :  { %4509 = vmatpush3.xpose.msk.msra.mxu0 %vm380_vm3, %v2596_v50  ;;  %4510 = vmatprep.mubr.msk.f32.mxu0 %vm4928_vm2, %v4927_v49 }
 0xf9f   :  { %4518 = vmatprep.subr.mxu0 %v4927_v49  ;;  %4525 = vmatprep.mubr.msk.f32.mxu1 %vm4928_vm2, %v4927_v49 }
 0xfa1   :  { %4511 = vmatmul.mubr.msk.f32.vlgmr.msra.gmra.mrb[28].mxu0 %vm380_vm3, %v5581_v43 }
 0xfa2   :  { %4519 = vmatpush3.xpose.msk.msra.mxu0 %vm380_vm3, %v2748_v51  ;;  %4520 = vmatprep.mubr.msk.f32.mxu0 %vm4928_vm2, %v4927_v49 }
 0xfa3   :  { %4528 = vmatprep.subr.mxu0 %v4927_v49 }
 0xfa5   :  { %4521 = vmatmul.mubr.msk.f32.vlgmr.msra.gmra.mrb[30].mxu0 %vm380_vm3, %v5589_v14 }
 0xfa6   :  { %4530 = vmatprep.mubr.msk.f32.mxu0 %vm4928_vm2, %v4927_v49 }
 0xffd   :  { %v2287_v52 = vpop.f32.mrb[18].mxu0 }
 0xffe   :  { %v2288_v53 = vadd.f32 %v2287_v52, %v5291_v8  ;;  %v4487_v54 = vpop.f32.mrb[19].mxu0 }
0x1000   :  { %v2823_v55 = vsel %vm380_vm3, %v2288_v53, -inf }
0x1001   :  { %2824 = vmax.xlane.f32.xlu0 %v2823_v55 }
0x1004   :  { %v2363_v56 = vpop.f32.mrb[20].mxu0 }
0x1005   :  { %v2364_v58 = vadd.f32 %v2363_v56, %v5291_v8  ;;  %v4492_v62 = vpop.f32.mrb[21].mxu0 }
0x1007   :  { %v2826_v63 = vsel %vm380_vm3, %v2364_v58, -inf }
0x1008   :  { %2827 = vmax.xlane.f32.xlu1 %v2826_v63 }
0x1068   :  { %v2439_v0 = vpop.f32.mrb[22].mxu0 }
0x1069   :  { %v2440_v1 = vadd.f32 %v2439_v0, %v5291_v8  ;;  %v4497_v2 = vpop.f32.mrb[23].mxu0 }
0x106b   :  { %v2829_v4 = vsel %vm380_vm3, %v2440_v1, -inf }
0x106c   :  { %2830 = vmax.xlane.f32.xlu0 %v2829_v4  ;;  %v2515_v5 = vpop.f32.mrb[24].mxu0 }
0x106d   :  { %v2516_v36 = vadd.f32 %v2515_v5, %v5291_v8  ;;  %v4502_v6 = vpop.f32.mrb[25].mxu0 }
0x106f   :  { %v2832_v7 = vsel %vm380_vm3, %v2516_v36, -inf }
0x1070   :  { %2833 = vmax.xlane.f32.xlu0 %v2832_v7  ;;  %v2591_v37 = vpop.f32.mrb[26].mxu0  ;;  %v2743_v9 = vpop.f32.mrb[28].mxu1 }
0x1071   :  { %v2592_v11 = vadd.f32 %v2591_v37, %v5291_v8  ;;  %v4507_v12 = vpop.f32.mrb[27].mxu0  ;;  %v4517_v13 = vpop.f32.mrb[29].mxu1  ;;  %v2744_v15 = vadd.f32 %v2743_v9, %v5291_v8 }
0x1073   :  { %v2835_v16 = vsel %vm380_vm3, %v2592_v11, -inf  ;;  %v2841_v21 = vsel %vm380_vm3, %v2744_v15, -inf }
0x1074   :  { %2836 = vmax.xlane.f32.xlu0 %v2835_v16  ;;  %v2667_v17 = vpop.f32.mrb[28].mxu0 }
0x1075   :  { %v2668_v18 = vadd.f32 %v2667_v17, %v5291_v8  ;;  %v4512_v19 = vpop.f32.mrb[29].mxu0 }
0x1077   :  { %v2838_v20 = vsel %vm380_vm3, %v2668_v18, -inf }
0x1078   :  { %2839 = vmax.xlane.f32.xlu1 %v2838_v20  ;;  %v2819_v22 = vpop.f32.mrb[30].mxu0  ;;  %2842 = vmax.xlane.f32.xlu0 %v2841_v21 }
0x1079   :  { %v2820_v23 = vadd.f32 %v2819_v22, %v5291_v8  ;;  %v4522_v24 = vpop.f32.mrb[31].mxu0 }
0x107b   :  { %v2844_v25 = vsel %vm380_vm3, %v2820_v23, -inf }
0x107c   :  { %2845 = vmax.xlane.f32.xlu1 %v2844_v25 }
0x108d   :  { %2987 = vrot.lane.b32.xlu1 %v5547_v60, %s4934_s24 }
0x108e   :  { %2911 = vrot.lane.b32.xlu0 %v5549_v38, %s4934_s24  ;;  %v2825_v8 = vpop.xlane.xlu0 %2824 }
0x108f   :  { %v2847_v26 = vsub.f32 %v2288_v53, %v2825_v8 }
0x1091   :  { %3063 = vrot.lane.b32.xlu1 %v5571_v40, %s4934_s24  ;;  %v2855_v27 = vmul.f32 1.442695, %v2847_v26 }
0x1092   :  { %3215 = vrot.lane.b32.xlu0 %v5575_v41, %s4934_s24 }
0x1093   :  { %4854 = vpow2.f32 %v2855_v27 }
0x1095   :  { %3139 = vrot.lane.b32.xlu1 %v5567_v39, %s4934_s24  ;;  %v2828_v28 = vpop.xlane.xlu1 %2827 }
0x1096   :  { %v2848_v29 = vsub.f32 %v2364_v58, %v2828_v28 }
0x1098   :  { %v2857_v30 = vmul.f32 1.442695, %v2848_v29 }
0x1099   :  { %3291 = vrot.lane.b32.xlu1 %v5581_v43, %s4934_s24 }
0x109a   :  { %4856 = vpow2.f32 %v2857_v30 }
0x109d   :  { %v5667_v31 = vpop.eup %4854 }
0x109e   :  { %v2871_v32 = vsel %vm380_vm3, %v5667_v31, 0.0 }
0x10a4   :  { %v5671_v33 = vpop.eup %4856 }
0x10a5   :  { %v2874_v34 = vsel %vm380_vm3, %v5671_v33, 0.0 }
0x10b1   :  { %2872 = vadd.xlane.f32.xlu0 %v2871_v32 }
0x10bd   :  { %2875 = vadd.xlane.f32.xlu1 %v2874_v34 }
0x10f9   :  { %v2831_v35 = vpop.xlane.xlu0 %2830 }
0x10fa   :  { %v2849_v60 = vsub.f32 %v2440_v1, %v2831_v35 }
0x10fc   :  { %v2859_v57 = vmul.f32 1.442695, %v2849_v60 }
0x10fd   :  { %v2834_v38 = vpop.xlane.xlu0 %2833 }
0x10fe   :  { %4858 = vpow2.f32 %v2859_v57  ;;  %v2850_v39 = vsub.f32 %v2516_v36, %v2834_v38 }
0x1100   :  { %v2861_v40 = vmul.f32 1.442695, %v2850_v39 }
0x1101   :  { %v2837_v41 = vpop.xlane.xlu0 %2836 }
0x1102   :  { %4860 = vpow2.f32 %v2861_v40  ;;  %v2851_v43 = vsub.f32 %v2592_v11, %v2837_v41 }
0x1104   :  { %v2863_v51 = vmul.f32 1.442695, %v2851_v43  ;;  %v4140_v43 = vld [vmem:[%s5883_s9 + $0x20] sm:$0xff] }
0x1105   :  { %v2840_v44 = vpop.xlane.xlu1 %2839  ;;  %v2843_v45 = vpop.xlane.xlu0 %2842 }
0x1106   :  { %v2852_v10 = vsub.f32 %v2668_v18, %v2840_v44  ;;  %v2853_v46 = vsub.f32 %v2744_v15, %v2843_v45  ;;  %v4141_v44 = vld [vmem:[%s5883_s9 + $0x28] sm:$0xff] }
0x1108   :  { %v4859_v47 = vpop.eup %4858  ;;  %v2865_v48 = vmul.f32 1.442695, %v2852_v10  ;;  %v2867_v50 = vmul.f32 1.442695, %v2853_v46  ;;  %v4731_v10 = vpack.c.bf16 %v4141_v44, %v4140_v43  ;;  %v4151_v44 = vld [vmem:[%s5886_s12 + $0x1] ss:$0 sm:$0xff] }
0x1109   :  { %v2846_v52 = vpop.xlane.xlu1 %2845  ;;  %v2912_v53 = vpop.permute.xlu0 %2911  ;;  %v2877_v54 = vsel %vm380_vm3, %v4859_v47, 0.0 }
0x110a   :  { %4862 = vpow2.f32 %v2865_v48  ;;  %v2854_v55 = vsub.f32 %v2820_v23, %v2846_v52  ;;  %2878 = vadd.xlane.f32.xlu0 %v2877_v54  ;;  %4524 = vmatpush3.msra.mxu1 %v2912_v53  ;;  %v4142_v48 = vld [vmem:[%s5883_s9 + $0x30] sm:$0xff] }
0x110b   :  { %4864 = vpow2.f32 %v2867_v50  ;;  %4533 = vmatprep.subr.mxu1 %v4927_v49  ;;  %v4143_v50 = vld [vmem:[%s5883_s9 + $0x38] sm:$0xff] }
0x110c   :  { %v4861_v56 = vpop.eup %4860  ;;  %v2869_v58 = vmul.f32 1.442695, %v2854_v55  ;;  %4866 = vpow2.f32 %v2863_v51  ;;  %v4735_v51 = vpack.c.bf16 %v4143_v50, %v4142_v48 }
0x110d   :  { %v2988_v62 = vpop.permute.xlu1 %2987  ;;  %v2880_v63 = vsel %vm380_vm3, %v4861_v56, 0.0  ;;  %v3216_v37 = vpop.permute.xlu0 %3215 }
0x110e   :  { %4868 = vpow2.f32 %v2869_v58  ;;  %4529 = vmatpush3.msra.mxu0 %v2988_v62  ;;  %2881 = vadd.xlane.f32.xlu1 %v2880_v63 }
0x110f   :  { %4538 = vmatprep.subr.mxu0 %v4927_v49 }
0x1111   :  { %v3064_v9 = vpop.permute.xlu1 %3063 }
0x1114   :  { %v4863_v0 = vpop.eup %4862 }
0x1115   :  { %v5679_v1 = vpop.eup %4864  ;;  %v2886_v2 = vsel %vm380_vm3, %v4863_v0, 0.0  ;;  %v3140_v12 = vpop.permute.xlu1 %3139 }
0x1116   :  { %2887 = vadd.xlane.f32.xlu1 %v2886_v2  ;;  %v2889_v4 = vsel %vm380_vm3, %v5679_v1, 0.0  ;;  %v4867_v5 = vpop.eup %4866 }
0x1117   :  { %2890 = vadd.xlane.f32.xlu0 %v2889_v4  ;;  %v2883_v7 = vsel %vm380_vm3, %v4867_v5, 0.0 }
0x1118   :  { %v4869_v36 = vpop.eup %4868 }
0x1119   :  { %v2892_v6 = vsel %vm380_vm3, %v4869_v36, 0.0  ;;  %v3292_v13 = vpop.permute.xlu1 %3291 }
0x111a   :  { %2893 = vadd.xlane.f32.xlu1 %v2892_v6 }
0x111b   :  { %2884 = vadd.xlane.f32.xlu0 %v2883_v7 }
0x112b   :  { %3443 = vrot.lane.b32.xlu1 %v5589_v14, %s4934_s24 }
0x1131   :  { %3367 = vrot.lane.b32.xlu0 %v5577_v42, %s4934_s24 }
0x113e   :  { %v2873_v11 = vpop.xlane.xlu0 %2872 }
0x113f   :  { %4870 = vrcp.f32 %v2873_v11 }
0x1149   :  { %v4871_v15 = vpop.eup %4870 }
0x114a   :  { %v2903_v16 = vmul.f32 %v4871_v15, %v5667_v31  ;;  %v2876_v17 = vpop.xlane.xlu1 %2875 }
0x114b   :  { %4872 = vrcp.f32 %v2876_v17 }
0x114c   :  { %4526 = vmatmul.mubr.msk.f32.vlgmr.msra.gmra.mrb[30].mxu1 %vm380_vm3, %v2903_v16 }
0x114d   :  { %4534 = vmatpush3.msra.mxu1 %v3064_v9  ;;  %4535 = vmatprep.mubr.msk.f32.mxu1 %vm4928_vm2, %v4927_v49 }
0x114e   :  { %4543 = vmatprep.subr.mxu1 %v4927_v49 }
0x1155   :  { %v4873_v42 = vpop.eup %4872 }
0x1156   :  { %v2904_v14 = vmul.f32 %v4873_v42, %v5671_v33 }
0x1158   :  { %4531 = vmatmul.mubr.msk.f32.vlgmr.msra.gmra.mrb[32].mxu0 %vm380_vm3, %v2904_v14 }
0x1159   :  { %4539 = vmatpush3.msra.mxu0 %v3140_v12  ;;  %4540 = vmatprep.mubr.msk.f32.mxu0 %vm4928_vm2, %v4927_v49 }
0x115a   :  { %4548 = vmatprep.subr.mxu0 %v4927_v49 }
0x1197   :  { %v2879_v18 = vpop.xlane.xlu0 %2878 }
0x1198   :  { %4874 = vrcp.f32 %v2879_v18 }
0x119b   :  { %v2882_v19 = vpop.xlane.xlu1 %2881 }
0x119c   :  { %4876 = vrcp.f32 %v2882_v19 }
0x11a2   :  { %v4875_v20 = vpop.eup %4874 }
0x11a3   :  { %v2905_v21 = vmul.f32 %v4875_v20, %v4859_v47  ;;  %v2888_v22 = vpop.xlane.xlu1 %2887 }
0x11a4   :  { %4878 = vrcp.f32 %v2888_v22  ;;  %v2891_v23 = vpop.xlane.xlu0 %2890 }
0x11a5   :  { %4536 = vmatmul.mubr.msk.f32.vlgmr.msra.gmra.mrb[32].mxu1 %vm380_vm3, %v2905_v21 }
0x11a6   :  { %v4877_v24 = vpop.eup %4876  ;;  %4544 = vmatpush3.msra.mxu1 %v3216_v37  ;;  %4545 = vmatprep.mubr.msk.f32.mxu1 %vm4928_vm2, %v4927_v49 }
0x11a7   :  { %v2906_v25 = vmul.f32 %v4877_v24, %v4861_v56  ;;  %v2894_v8 = vpop.xlane.xlu1 %2893  ;;  %4553 = vmatprep.subr.mxu1 %v4927_v49 }
0x11a8   :  { %4880 = vrcp.f32 %v2894_v8  ;;  %v2885_v26 = vpop.xlane.xlu0 %2884 }
0x11a9   :  { %4882 = vrcp.f32 %v2885_v26  ;;  %4541 = vmatmul.mubr.msk.f32.vlgmr.msra.gmra.mrb[34].mxu0 %vm380_vm3, %v2906_v25 }
0x11aa   :  { %4549 = vmatpush3.msra.mxu0 %v3292_v13  ;;  %4550 = vmatprep.mubr.msk.f32.mxu0 %vm4928_vm2, %v4927_v49  ;;  %4884 = vrcp.f32 %v2891_v23  ;;  %v4145_v13 = vld [vmem:[%s5884_s10 + $0x1] ss:$0 sm:$0xff] }
0x11ab   :  { %4558 = vmatprep.subr.mxu0 %v4927_v49  ;;  %v3444_v29 = vpop.permute.xlu1 %3443 }
0x11ac   :  { %v3368_v35 = vpop.permute.xlu0 %3367 }
0x11ae   :  { %v4879_v27 = vpop.eup %4878 }
0x11af   :  { %v2908_v28 = vmul.f32 %v4879_v27, %v4863_v0 }
0x11b1   :  { %4551 = vmatmul.mubr.msk.f32.vlgmr.msra.gmra.mrb[36].mxu0 %vm380_vm3, %v2908_v28  ;;  %v4152_v28 = vld [vmem:[%s5887_s13 + $0x20] sm:$0xff] }
0x11b2   :  { %v4881_v30 = vpop.eup %4880  ;;  %4559 = vmatpush3.msra.mxu0 %v3444_v29  ;;  %4560 = vmatprep.mubr.msk.f32.mxu0 %vm4928_vm2, %v4927_v49  ;;  %v4153_v29 = vld [vmem:[%s5887_s13 + $0x28] sm:$0xff] }
0x11b3   :  { %v4883_v31 = vpop.eup %4882  ;;  %v2910_v32 = vmul.f32 %v4881_v30, %v4869_v36  ;;  %v4739_v30 = vpack.c.bf16 %v4153_v29, %v4152_v28 }
0x11b4   :  { %v2907_v33 = vmul.f32 %v4883_v31, %v4867_v5  ;;  %v4885_v34 = vpop.eup %4884  ;;  %v4154_v31 = vld [vmem:[%s5887_s13 + $0x30] sm:$0xff] }
0x11b5   :  { %4561 = vmatmul.mubr.msk.f32.vlgmr.msra.gmra.mrb[38].mxu0 %vm380_vm3, %v2910_v32  ;;  %v2909_v60 = vmul.f32 %v4885_v34, %v5679_v1  ;;  %4740 = vmatprep.subr.bf16.mxu0 %v4739_v30  ;;  %v4155_v32 = vld [vmem:[%s5887_s13 + $0x38] sm:$0xff] }
0x11b6   :  { %4546 = vmatmul.mubr.msk.f32.vlgmr.msra.gmra.mrb[34].mxu1 %vm380_vm3, %v2907_v33  ;;  %4742 = vmatpush3.bf16.msra.mxu0 %v4739_v30  ;;  %v4743_v33 = vpack.c.bf16 %v4155_v32, %v4154_v31  ;;  %v4179_v30 = vld [vmem:[%s5890_s16 + $0x1] ss:$0 sm:$0xff] }
0x11b7   :  { %4554 = vmatpush3.msra.mxu1 %v3368_v35  ;;  %4555 = vmatprep.mubr.msk.f32.mxu1 %vm4928_vm2, %v4927_v49 }
0x11b8   :  { %4732 = vmatprep.subr.bf16.mxu1 %v4731_v10  ;;  %4744 = vmatprep.subr.bf16.mxu0 %v4743_v33 }
0x11ba   :  { %4556 = vmatmul.mubr.msk.f32.vlgmr.msra.gmra.mrb[36].mxu1 %vm380_vm3, %v2909_v60  ;;  %4746 = vmatpush3.bf16.msra.mxu0 %v4743_v33 }
0x11bb   :  { %4734 = vmatpush3.bf16.msra.mxu1 %v4731_v10  ;;  %4779 = vmatprep.subr.bf16.mxu0 %v4926_v3 }
0x11bc   :  { %4736 = vmatprep.subr.bf16.mxu1 %v4735_v51 }
0x11bf   :  { %4738 = vmatpush3.bf16.msra.mxu1 %v4735_v51  ;;  %v4162_v51 = vld [vmem:[%s5889_s15 + $0x80] sm:$0xff] }
0x121f   :  { %v2983_v57 = vpop.f32.mrb[30].mxu1 }
0x1220   :  { %v4527_v38 = vpop.f32.mrb[31].mxu1 }
0x122b   :  { %v3059_v39 = vpop.f32.mrb[32].mxu0 }
0x122c   :  { %v4532_v40 = vpop.f32.mrb[33].mxu0 }
0x1278   :  { %v3135_v41 = vpop.f32.mrb[32].mxu1 }
0x1279   :  { %3521 = vrot.lane.b32.xlu0 %v3135_v41, %s4935_s27  ;;  %v4537_v45 = vpop.f32.mrb[33].mxu1  ;;  %v4150_v41 = vld [vmem:[%s5885_s11 + $0x1] ss:$0 sm:$0xff] }
0x127c   :  { %v3211_v46 = vpop.f32.mrb[34].mxu0 }
0x127d   :  { %3523 = vrot.lane.b32.xlu1 %v3211_v46, %s4935_s27  ;;  %v4542_v47 = vpop.f32.mrb[35].mxu0 }
0x1284   :  { %v3363_v52 = vpop.f32.mrb[36].mxu0 }
0x1285   :  { %3531 = vrot.lane.b32.xlu1 %v3363_v52, %s4936_s30  ;;  %v4552_v53 = vpop.f32.mrb[37].mxu0  ;;  %v4163_v52 = vld [vmem:[%s5889_s15 + $0x88] sm:$0xff] }
0x1286   :  { %v4747_v53 = vpack.c.bf16 %v4163_v52, %v4162_v51  ;;  %v3959_v51 = vld [vmem:[%s5893_s19 + $0x10] sm:$0xff] }
0x1288   :  { %v3515_v54 = vpop.f32.mrb[38].mxu0  ;;  %4748 = vmatprep.subr.bf16.mxu1 %v4747_v53 }
0x1289   :  { %v3287_v55 = vpop.f32.mrb[34].mxu1  ;;  %3539 = vrot.lane.b32.xlu1 %v3515_v54, %s5910_s29  ;;  %v4562_v56 = vpop.f32.mrb[39].mxu0  ;;  %v4164_v54 = vld [vmem:[%s5889_s15 + $0x90] sm:$0xff] }
0x128a   :  { %3529 = vrot.lane.b32.xlu0 %v3287_v55, %s4936_s30  ;;  %v4547_v58 = vpop.f32.mrb[35].mxu1  ;;  %v4165_v55 = vld [vmem:[%s5889_s15 + $0x98] sm:$0xff]  ;;  %v4166_v56 = vld [vmem:[%s5889_s15 + $0xa0] sm:$0xff] }
0x128b   :  { %v4167_v58 = vld [vmem:[%s5889_s15 + $0xa8] sm:$0xff] }
0x128d   :  { %v3439_v62 = vpop.f32.mrb[36].mxu1 }
0x128e   :  { %3537 = vrot.lane.b32.xlu0 %v3439_v62, %s5910_s29  ;;  %v4557_v63 = vpop.f32.mrb[37].mxu1  ;;  %v4755_v62 = vpack.c.bf16 %v4167_v58, %v4166_v56 }
0x128f   :  { %v4168_v63 = vld [vmem:[%s5889_s15 + $0xb0] sm:$0xff] }
0x12eb   :  { %v3522_v1 = vpop.permute.xlu0 %3521 }
0x12ec   :  { %v3543_v5 = vsel %vm380_vm3, %v2983_v57, %v3522_v1 }
0x12ef   :  { %v3524_v0 = vpop.permute.xlu1 %3523 }
0x12f0   :  { %v3544_v6 = vsel %vm380_vm3, %v3059_v39, %v3524_v0  ;;  %v4169_v0 = vld [vmem:[%s5889_s15 + $0xb8] sm:$0xff] }
0x12f1   :  { %v4759_v1 = vpack.c.bf16 %v4169_v0, %v4168_v63  ;;  %v4180_v0 = vld [vmem:[%s5891_s17] ss:$0 sm:$0xff]  ;;  %s4938_s17 = smov [#allocation2]  }
0x12f2   :  { %s4052_s23 = sshll.u32 %s4938_s17, 4  ;;  %s4053_s23 = int_to_ptr.vmem [resolvable:$true] %s4052_s23 }
0x12f3   :  { %p4907_p1 = scmp.lt.s32.totalorder %s4053_s23, %s4053_s23 }
0x12f7   :  { %v3532_v2 = vpop.permute.xlu1 %3531 }
0x12f8   :  { %v3546_v9 = vsel %vm1709_vm5, %v3544_v6, %v3532_v2  ;;  %v4170_v2 = vld [vmem:[%s5889_s15 + $0xc0] sm:$0xff]  ;;  %v4173_v6 = vld [vmem:[%s5889_s15 + $0xd8] sm:$0xff] }
0x12fb   :  { %v3540_v36 = vpop.permute.xlu1 %3539 }
0x12fc   :  { %v3530_v4 = vpop.permute.xlu0 %3529  ;;  %v3548_v12 = vsel %vm1712_vm6, %v3546_v9, %v3540_v36  ;;  %v4172_v36 = vld [vmem:[%s5889_s15 + $0xd0] sm:$0xff]  ;;  %v4175_v9 = vld [vmem:[%s5889_s15 + $0xe8] sm:$0xff] }
0x12fd   :  { %v3545_v7 = vsel %vm1709_vm5, %v3543_v5, %v3530_v4  ;;  %v4171_v4 = vld [vmem:[%s5889_s15 + $0xc8] sm:$0xff] }
0x12fe   :  { %v4763_v5 = vpack.c.bf16 %v4171_v4, %v4170_v2 }
0x1300   :  { %v3538_v37 = vpop.permute.xlu0 %3537 }
0x1301   :  { %v3547_v11 = vsel %vm1712_vm6, %v3545_v7, %v3538_v37  ;;  %v4767_v7 = vpack.c.bf16 %v4173_v6, %v4172_v36  ;;  %v4174_v37 = vld [vmem:[%s5889_s15 + $0xe0] sm:$0xff] }
0x1302   :  { %4571 = vmatprep.mubr.msk.f32.mxu1 %vm180_vm1, %v3547_v11  ;;  %v4771_v11 = vpack.c.bf16 %v4175_v9, %v4174_v37 }
0x1303   :  { %4572 = vmatmul.mubr.msk.f32.vlgmr.msra.gmra.mrb[38].mxu1 %vm180_vm1, %v3548_v12  ;;  %v4176_v12 = vld [vmem:[%s5889_s15 + $0xf0] sm:$0xff] }
0x1304   :  { %4750 = vmatpush3.bf16.msra.mxu1 %v4747_v53  ;;  %v3960_v53 = vld [vmem:[%s5893_s19 + $0x18] sm:$0xff] }
0x13d6   :  { %v4573_v15 = vpop.f32.mrb[38].mxu1 }
0x13d7   :  { %v3640_v16 = vadd.f32 %v4573_v15, %v4145_v13  ;;  %v3634_v17 = vpop.f32.mrb[39].mxu1 }
0x13d8   :  { %v3635_v42 = vadd.f32 %v4145_v13, %v3634_v17  ;;  %v4177_v13 = vld [vmem:[%s5889_s15 + $0xf8] sm:$0xff] }
0x13d9   :  { %v5747_v14 = vadd.f32 %v3640_v16, %v5508_v59  ;;  %v4775_v15 = vpack.c.bf16 %v4177_v13, %v4176_v12  ;;  %v4157_v16 = vld [vmem:[%s5888_s14 + $0x1] ss:$0 sm:$0xff] }
0x13da   :  { %v5750_v18 = vadd.f32 %v3635_v42, %v5511_v61 }
0x13db   :  { %v3652_v19 = vsel %vm180_vm1, %v5747_v14, 0.0 }
0x13dc   :  { %3653 = vadd.xlane.f32.xlu1 %v3652_v19  ;;  %v3649_v20 = vsel %vm180_vm1, %v5750_v18, 0.0 }
0x13dd   :  { %3650 = vadd.xlane.f32.xlu0 %v3649_v20 }
0x1469   :  { %v3654_v21 = vpop.xlane.xlu1 %3653 }
0x146a   :  { %v3656_v22 = vmul.f32 0.03125, %v3654_v21  ;;  %v3651_v23 = vpop.xlane.xlu0 %3650 }
0x146b   :  { %v3655_v24 = vmul.f32 0.03125, %v3651_v23 }
0x146c   :  { %v3658_v25 = vsub.f32 %v5747_v14, %v3656_v22 }
0x146d   :  { %v3657_v59 = vsub.f32 %v5750_v18, %v3655_v24 }
0x146e   :  { %v3660_v26 = vmul.f32 %v3658_v25, %v3658_v25 }
0x146f   :  { %v3659_v8 = vmul.f32 %v3657_v59, %v3657_v59 }
0x1470   :  { %v3664_v27 = vsel %vm180_vm1, %v3660_v26, 0.0 }
0x1471   :  { %v3661_v61 = vsel %vm180_vm1, %v3659_v8, 0.0 }
0x1472   :  { %3662 = vadd.xlane.f32.xlu0 %v3661_v61 }
0x1476   :  { %3665 = vadd.xlane.f32.xlu0 %v3664_v27 }
0x14ff   :  { %v3663_v34 = vpop.xlane.xlu0 %3662 }
0x1500   :  { %v3667_v35 = vmul.f32 0.03125, %v3663_v34 }
0x1502   :  { %v3669_v60 = vadd.f32 1e-05, %v3667_v35 }
0x1503   :  { %v3666_v57 = vpop.xlane.xlu0 %3665 }
0x1504   :  { %4886 = vrsqrt.f32 %v3669_v60  ;;  %v3668_v38 = vmul.f32 0.03125, %v3666_v57 }
0x1506   :  { %v3670_v39 = vadd.f32 1e-05, %v3668_v38 }
0x1508   :  { %4888 = vrsqrt.f32 %v3670_v39 }
0x150e   :  { %v4887_v40 = vpop.eup %4886 }
0x150f   :  { %v3673_v43 = vmul.f32 %v4887_v40, %v3657_v59 }
0x1511   :  { %v3681_v45 = vmul.f32 %v4150_v41, %v3673_v43 }
0x1512   :  { %v4889_v10 = vpop.eup %4888 }
0x1513   :  { %v3674_v46 = vmul.f32 %v4889_v10, %v3658_v25  ;;  %v3689_v47 = vadd.f32 %v4151_v44, %v3681_v45 }
0x1515   :  { %v3682_v48 = vmul.f32 %v4150_v41, %v3674_v46  ;;  %4582 = vmatprep.mubr.msk.f32.mxu0 %vm180_vm1, %v3689_v47 }
0x1517   :  { %v3690_v50 = vadd.f32 %v4151_v44, %v3682_v48 }
0x1519   :  { %4583 = vmatmul.mubr.msk.f32.vlgmr.msra.gmra.mrb[40].mxu0 %vm180_vm1, %v3690_v50  ;;  %v3958_v50 = vld [vmem:[%s5893_s19 + $0x8] sm:$0xff] }
0x151a   :  { %4628 = vmatprep.mubr.msk.f32.mxu0 %vm4928_vm2, %v4927_v49  ;;  %v4751_v49 = vpack.c.bf16 %v4165_v55, %v4164_v54  ;;  %v4783_v54 = vpack.c.bf16 %v3960_v53, %v3959_v51 }
0x151c   :  { %4752 = vmatprep.subr.bf16.mxu1 %v4751_v49 }
0x151d   :  { %4754 = vmatpush3.bf16.msra.mxu1 %v4751_v49 }
0x151e   :  { %4756 = vmatprep.subr.bf16.mxu1 %v4755_v62 }
0x1521   :  { %4758 = vmatpush3.bf16.msra.mxu1 %v4755_v62 }
0x1522   :  { %4760 = vmatprep.subr.bf16.mxu1 %v4759_v1 }
0x1525   :  { %4762 = vmatpush3.bf16.msra.mxu1 %v4759_v1 }
0x1526   :  { %4764 = vmatprep.subr.bf16.mxu1 %v4763_v5 }
0x1529   :  { %4766 = vmatpush3.bf16.msra.mxu1 %v4763_v5  ;;  %v4181_v5 = vld [vmem:[%s5892_s18] ss:$0 sm:$0xff]  ;;  %s4902_s18 = scalar_lea.vmem %s4053_s23, 32 }
0x152a   :  { %4768 = vmatprep.subr.bf16.mxu1 %v4767_v7  ;;  %p4903_p0 = scmp.ne.s32.totalorder %s4053_s23, %s4902_s18  ;;  %p4908_p2 = scmp.lt.s32.totalorder %s4902_s18, %s4902_s18 }
0x152c   :  { %p4909_p3 = por %p4908_p2, %p4907_p1 }
0x152d   :  { %4770 = vmatpush3.bf16.msra.mxu1 %v4767_v7 }
0x152e   :  { %4772 = vmatprep.subr.bf16.mxu1 %v4771_v11  ;;  %p4910_p4 = pnand %p4909_p3, %p4903_p0 }
0x1531   :  { %4774 = vmatpush3.bf16.msra.mxu1 %v4771_v11 }
0x1532   :  { %4776 = vmatprep.subr.bf16.mxu1 %v4775_v15 }
0x1535   :  { %4778 = vmatpush3.bf16.msra.mxu1 %v4775_v15 }
0x15ec   :  { %v4584_v17 = vpop.f32.mrb[40].mxu0 }
0x15ed   :  { %v3782_v42 = vadd.f32 %v4584_v17, %v4157_v16  ;;  %v3776_v19 = vpop.f32.mrb[41].mxu0 }
0x15ee   :  { %v3777_v20 = vadd.f32 %v4157_v16, %v3776_v19 }
0x15ef   :  { %v4161_v21 = vmul.f32 -1.702, %v3782_v42 }
0x15f0   :  { %v4160_v22 = vmul.f32 -1.702, %v3777_v20 }
0x15f1   :  { %v3791_v23 = vmul.f32 1.442695, %v4161_v21 }
0x15f2   :  { %v3789_v24 = vmul.f32 1.442695, %v4160_v22 }
0x15f3   :  { %4890 = vpow2.f32 %v3791_v23 }
0x15f4   :  { %4892 = vpow2.f32 %v3789_v24 }
0x15fd   :  { %v4891_v25 = vpop.eup %4890 }
0x15fe   :  { %v4893_v59 = vpop.eup %4892  ;;  %v3794_v8 = vadd.f32 1.0, %v4891_v25 }
0x15ff   :  { %v3793_v61 = vadd.f32 1.0, %v4893_v59 }
0x1600   :  { %4894 = vrcp.f32 %v3794_v8 }
0x1601   :  { %4896 = vrcp.f32 %v3793_v61 }
0x160a   :  { %v4895_v26 = vpop.eup %4894 }
0x160b   :  { %v4897_v27 = vpop.eup %4896  ;;  %v3800_v29 = vmul.f32 %v4895_v26, %v3782_v42 }
0x160c   :  { %v3799_v28 = vmul.f32 %v4897_v27, %v3777_v20 }
0x160e   :  { %4617 = vmatprep.mubr.f32.mxu1 %v3799_v28 }
0x160f   :  { %4618 = vmatmul.mubr.f32.vlgmr.msra.gmra.mrb[40].mxu1 %v3800_v29 }
0x16e2   :  { %v4619_v31 = vpop.f32.mrb[40].mxu1 }
0x16e3   :  { %v3898_v32 = vadd.f32 %v4619_v31, %v4179_v30  ;;  %v3892_v33 = vpop.f32.mrb[41].mxu1 }
0x16e4   :  { %v3893_v34 = vadd.f32 %v4179_v30, %v3892_v33 }
0x16e5   :  { %v3902_v35 = vadd.f32 %v3898_v32, %v5747_v14 }
0x16e6   :  { %v3901_v60 = vadd.f32 %v3893_v34, %v5750_v18  ;;  %v3957_v18 = vld [vmem:[%s5893_s19] sm:$0xff] }
0x16e7   :  { %v3907_v57 = vrot.slane %v3902_v35, 7  ;;  %v4780_v52 = vpack.c.bf16 %v3958_v50, %v3957_v18 }
0x16e9   :  { %v3909_v38 = vsel %vm3908_vm7, %v3907_v57, %v3901_v60  ;;  %4781 = vmatpush3.bf16.msra.mxu0 %v4780_v52 }
0x16ea   :  { %v3912_v39 = vsel %vm3911_vm8, %v3909_v38, 0.0  ;;  %4782 = vmatprep.subr.bf16.mxu0 %v4926_v3 }
0x16eb   :  { %3913 = vadd.xlane.f32.xlu0 %v3912_v39 }
0x16ed   :  { %4784 = vmatpush3.bf16.msra.mxu0 %v4783_v54 }
0x1778   :  { %v3914_v40 = vpop.xlane.xlu0 %3913 }
0x1779   :  { %v3915_v41 = vmul.f32 0.03125, %v3914_v40 }
0x177b   :  { %v3917_v43 = vrot.slane %v3915_v41, 1  ;;  %v3920_v44 = vsub.f32 %v3901_v60, %v3915_v41 }
0x177d   :  { %v3921_v45 = vsub.f32 %v3902_v35, %v3917_v43  ;;  %v3922_v46 = vmul.f32 %v3920_v44, %v3920_v44 }
0x177f   :  { %v3923_v10 = vmul.f32 %v3921_v45, %v3921_v45 }
0x1781   :  { %v3926_v47 = vrot.slane %v3923_v10, 7 }
0x1783   :  { %v3927_v48 = vsel %vm3908_vm7, %v3926_v47, %v3922_v46 }
0x1784   :  { %v3929_v14 = vsel %vm3911_vm8, %v3927_v48, 0.0 }
0x1785   :  { %3930 = vadd.xlane.f32.xlu1 %v3929_v14 }
0x1812   :  { %v3931_v55 = vpop.xlane.xlu1 %3930 }
0x1813   :  { %v3932_v49 = vmul.f32 0.03125, %v3931_v55 }
0x1815   :  { %v3933_v56 = vadd.f32 1e-05, %v3932_v49 }
0x1817   :  { %4898 = vrsqrt.f32 %v3933_v56 }
0x1821   :  { %v4899_v58 = vpop.eup %4898 }
0x1822   :  { %v3936_v62 = vrot.slane %v4899_v58, 1  ;;  %v3939_v63 = vmul.f32 %v4899_v58, %v3920_v44 }
0x1824   :  { %v3940_v1 = vmul.f32 %v3936_v62, %v3921_v45  ;;  %v3947_v2 = vmul.f32 %v4180_v0, %v3939_v63 }
0x1826   :  { %v3948_v4 = vmul.f32 %v4180_v0, %v3940_v1  ;;  %v3955_v36 = vadd.f32 %v4181_v5, %v3947_v2 }
0x1828   :  { %v3956_v3 = vadd.f32 %v4181_v5, %v3948_v4 }
0x182a   :  { %v3963_v6 = vrot.slane %v3956_v3, 7 }
0x182c   :  { %v3964_v7 = vsel %vm3908_vm7, %v3963_v6, %v3955_v36 }
0x182d   :  { %4629 = vmatmul.mubr.msk.f32.vlgmr.msra.gmra.mrb[42].mxu0 %vm180_vm1, %v3964_v7 }
0x1900   :  { %v4033_v37 = vpop.f32.mrb[42].mxu0 }
0x1901   :  { %v4037_v9 = vmul.f32 %v4033_v37, %v4033_v37  ;;  %v4630_v11 = vpop.f32.mrb[43].mxu0 }
0x1903   :  { %v4039_v12 = vsel %vm4038_vm9, %v4037_v9, 0.0 }
0x1904   :  { %4040 = vadd.xlane.f32.xlu0 %v4039_v12 }
0x1991   :  { %v4041_v13 = vpop.xlane.xlu0 %4040 }
0x1992   :  { %v4042_v15 = vmax.f32 %v4041_v13, 1e-24 }
0x1994   :  { %4900 = vrsqrt.f32 %v4042_v15 }
0x199e   :  { %v4901_v16 = vpop.eup %4900 }
0x199f   :  { %v4044_v17 = vmul.f32 %v4901_v16, %v4033_v37 }
0x19a1   :  { %4045 = vst.msk [vmem:[#allocation2] sm:$0x3] %vm4038_vm9, %v4044_v17 }
0x19a2   :  { %4913 = shalt.err (!%p4910_p4)
}
0x19a3   :  { %s4914_s6 = scalar_lea.hbm %s5894_s20, 32 }
0x19a4   :  { %p4915_p5 = scmp.ne.s32.totalorder %s5894_s20, %s4914_s6  ;;  %p4918_p6 = scmp.lt.u32.totalorder %s4914_s6, %s5894_s20 }
0x19a6   :  { %p4920_p7 = pnand %p4918_p6, %p4915_p5 }
0x19a8   :  { %4923 = shalt.err (!%p4920_p7)
}
0x19a9   :  { %4055 = dma.vmem_to_hbm [thread:$0]  %s4053_s23, 32, %s5894_s20, [#allocation3]  }
0x19aa   :  { %4924 = dma.done.wait [#allocation3], 32  }
0x19ab   :  { %4925 = vsyncadd [#allocation3], 4294967264 }
0x19ac   :  { %4059 = vsyncpa [#allocation3], 1 }

</bundles_post_ra>
